<compile_context>
chip_gen: v5e
topology: v5e:2x2
jax: 0.10.0
libtpu: 0.0.40
codegen_flags: <defaults>
</compile_context>

<pallas_src>
import math

import jax
import jax.numpy as jnp
from jax.experimental import pallas as pl
from jax.experimental.pallas import tpu as pltpu

# ----------------------------- config ---------------------------------------
B = 2          # batch
S = 8          # target sequence length
S_SRC = 8      # source (encoder) sequence length
D_MODEL = 32
NUM_HEADS = 4
D_K = D_MODEL // NUM_HEADS
D_FF = 64
LN_EPS = 1e-5
_SCALE = 1.0 / math.sqrt(D_K)
_NEG = -1.0e9

# --- packed-parameter layout (rows of the 32-lane slab) ----------------------
# 8 attention weights (32 rows each), then W_fc2 (64 rows), then 15 bias /
# layer-norm rows.  The 64-lane slab holds W_fc1 (32 rows) + b_fc1 (1 row).
_WFC2_ROW0 = 8 * D_MODEL                  # 256
_BIAS_ROW0 = _WFC2_ROW0 + D_FF            # 320
_P32_ROWS = _BIAS_ROW0 + 15               # 335
_P64_ROWS = D_MODEL + 1                   # 33


# ----------------------------- kernel helpers --------------------------------
def _layer_norm(x, gamma, beta):
    mu = jnp.mean(x, axis=-1, keepdims=True)
    var = jnp.mean((x - mu) ** 2, axis=-1, keepdims=True)
    return (x - mu) * jax.lax.rsqrt(var + LN_EPS) * gamma + beta


def _heads(x2d):
    """(rows, H*Dk) lane-packed -> (H, rows, Dk) via static lane slices."""
    return jnp.stack(
        [x2d[:, h * D_K:(h + 1) * D_K] for h in range(NUM_HEADS)], axis=0)


def _mha(xq, xkv, bias, wq, bq, wk, bk, wv, bv, wo, bo):
    """Multi-head attention over the folded batch.

    xq:   (B*s_q, D)          query-side rows (all batch elements stacked)
    xkv:  (B*s_k, D)          key/value-side rows
    bias: (B*s_q, B*s_k)      additive block-diagonal mask bias (0 = keep,
                              -1e9 = masked or cross-batch)
    Weights/biases are in the original torch layout (y = x @ W + b).
    Returns (B*s_q, D).
    """
    # Q/K/V: one full-width 2-D matmul each (heads stay packed in lanes).
    q2d = jnp.dot(xq, wq, preferred_element_type=jnp.float32) + bq
    k2d = jnp.dot(xkv, wk, preferred_element_type=jnp.float32) + bk
    v2d = jnp.dot(xkv, wv, preferred_element_type=jnp.float32) + bv

    q = _heads(q2d)                       # (H, B*s_q, Dk)
    k = _heads(k2d)                       # (H, B*s_k, Dk)
    v = _heads(v2d)                       # (H, B*s_k, Dk)

    # All batches & heads at once; cross-batch blocks are killed by the bias.
    scores = jnp.einsum('hqd,hkd->hqk', q, k,
                        preferred_element_type=jnp.float32) * _SCALE
    scores = scores + bias[None, :, :]    # (H, B*s_q, B*s_k)

    m = jnp.max(scores, axis=-1, keepdims=True)
    e = jnp.exp(scores - m)
    probs = e / jnp.sum(e, axis=-1, keepdims=True)      # exact divide

    ctx = jnp.einsum('hqk,hkd->hqd', probs, v,
                     preferred_element_type=jnp.float32)          # (H,B*s_q,Dk)

    # combine_heads(ctx) @ W_o  ==  sum_h ctx[h] @ W_o[h*Dk:(h+1)*Dk, :]
    wo_h = wo.reshape(NUM_HEADS, D_K, D_MODEL)  # tile-aligned leading regroup
    oh = jnp.einsum('hqd,hde->hqe', ctx, wo_h,
                    preferred_element_type=jnp.float32)           # (H,B*s_q,D)
    return jnp.sum(oh, axis=0) + bo                               # (B*s_q, D)


def decoder_layer_kernel(x_ref, enc_ref, self_bias_ref, cross_bias_ref,
                         p32_ref, p64_ref, out_ref):
    # ---- unpack parameters from the two packed slabs (static ref slices) ----
    def w32(i):
        return p32_ref[pl.ds(i * D_MODEL, D_MODEL), :]

    def row32(i):
        return p32_ref[pl.ds(_BIAS_ROW0 + i, 1), :]

    wq1, wk1, wv1, wo1 = w32(0), w32(1), w32(2), w32(3)
    wq2, wk2, wv2, wo2 = w32(4), w32(5), w32(6), w32(7)
    w_fc2 = p32_ref[pl.ds(_WFC2_ROW0, D_FF), :]
    (bq1, bk1, bv1, bo1, bq2, bk2, bv2, bo2, b_fc2,
     g1, be1, g2, be2, g3, be3) = [row32(i) for i in range(15)]
    w_fc1 = p64_ref[pl.ds(0, D_MODEL), :]
    b_fc1 = p64_ref[pl.ds(D_MODEL, 1), :]

    x = x_ref[...]                 # (B*S, D)
    enc = enc_ref[...]             # (B*S_SRC, D)
    self_bias = self_bias_ref[...]     # (B*S, B*S)
    cross_bias = cross_bias_ref[...]   # (B*S, B*S_SRC)

    # ---- self attention + residual + norm1 (dropout == identity, eval) ----
    attn1 = _mha(x, x, self_bias, wq1, bq1, wk1, bk1, wv1, bv1, wo1, bo1)
    x1 = _layer_norm(x + attn1, g1, be1)

    # ---- cross attention + residual + norm2 ----
    attn2 = _mha(x1, enc, cross_bias, wq2, bq2, wk2, bk2, wv2, bv2, wo2, bo2)
    x2 = _layer_norm(x1 + attn2, g2, be2)

    # ---- position-wise feed-forward + residual + norm3 ----
    h = jnp.maximum(
        jnp.dot(x2, w_fc1, preferred_element_type=jnp.float32) + b_fc1, 0.0)
    ff = jnp.dot(h, w_fc2, preferred_element_type=jnp.float32) + b_fc2
    x3 = _layer_norm(x2 + ff, g3, be3)

    out_ref[...] = x3.astype(out_ref.dtype)


# ----------------------------- wrapper ---------------------------------------
def _block_diag_bias(mask):
    """mask: (B, s_q, s_k) with 0 => masked.  Returns (B*s_q, B*s_k) additive
    bias: 0 where attention is allowed, -1e9 where masked or cross-batch."""
    b, s_q, s_k = mask.shape
    eye = jnp.eye(b, dtype=jnp.float32)
    keep = eye[:, None, :, None] * mask[:, :, None, :].astype(jnp.float32)
    return ((1.0 - keep) * _NEG).reshape(b * s_q, b * s_k)


def decoder_layer(x, enc_output, src_mask, tgt_mask, params):
    """x: (B,S,D), enc_output: (B,S_SRC,D), src_mask: (B,S,S_SRC),
    tgt_mask: (B,S,S). params: original (in,out)-layout weight list."""
    (wq1, bq1, wk1, bk1, wv1, bv1, wo1, bo1,
     wq2, bq2, wk2, bk2, wv2, bv2, wo2, bo2,
     w_fc1, b_fc1, w_fc2, b_fc2,
     g1, be1, g2, be2, g3, be3) = params

    # Pack the 26 parameter tensors into two lane-grouped slabs (2 DMAs).
    pack32 = jnp.concatenate(
        [wq1, wk1, wv1, wo1, wq2, wk2, wv2, wo2, w_fc2,
         bq1, bk1, bv1, bo1, bq2, bk2, bv2, bo2, b_fc2,
         g1, be1, g2, be2, g3, be3], axis=0).astype(jnp.float32)
    pack64 = jnp.concatenate([w_fc1, b_fc1], axis=0).astype(jnp.float32)
    assert pack32.shape == (_P32_ROWS, D_MODEL)
    assert pack64.shape == (_P64_ROWS, D_FF)

    # Fold batch into sublanes; precompute additive block-diagonal mask biases.
    x2d = x.reshape(B * S, D_MODEL)
    enc2d = enc_output.reshape(B * S_SRC, D_MODEL)
    self_bias = _block_diag_bias(tgt_mask)    # (B*S, B*S)
    cross_bias = _block_diag_bias(src_mask)   # (B*S, B*S_SRC)

    in_specs = [
        pl.BlockSpec((B * S, D_MODEL), lambda i: (0, 0)),          # x (folded)
        pl.BlockSpec((B * S_SRC, D_MODEL), lambda i: (0, 0)),      # enc
        pl.BlockSpec((B * S, B * S), lambda i: (0, 0)),            # self bias
        pl.BlockSpec((B * S, B * S_SRC), lambda i: (0, 0)),        # cross bias
        pl.BlockSpec((_P32_ROWS, D_MODEL), lambda i: (0, 0)),      # param slab 32
        pl.BlockSpec((_P64_ROWS, D_FF), lambda i: (0, 0)),         # param slab 64
    ]
    out_spec = pl.BlockSpec((B * S, D_MODEL), lambda i: (0, 0))

    out2d = pl.pallas_call(
        decoder_layer_kernel,
        out_shape=jax.ShapeDtypeStruct((B * S, D_MODEL), x.dtype),
        grid_spec=pltpu.PrefetchScalarGridSpec(
            num_scalar_prefetch=0,
            grid=(1,),                      # whole layer in one grid step
            in_specs=in_specs,
            out_specs=out_spec,
        ),
        compiler_params=pltpu.CompilerParams(
            dimension_semantics=("arbitrary",)),
    )(x2d, enc2d, self_bias, cross_bias, pack32, pack64)

    return out2d.reshape(B, S, D_MODEL)


# ----------------------------- reference (plain JAX) -------------------------
def _ref_mha(xq, xkv, mask, wq, bq, wk, bk, wv, bv, wo, bo):
    Bq, Sq, _ = xq.shape
    Sk = xkv.shape[1]
    q = (xq @ wq + bq).reshape(Bq, Sq, NUM_HEADS, D_K).transpose(0, 2, 1, 3)
    k = (xkv @ wk + bk).reshape(Bq, Sk, NUM_HEADS, D_K).transpose(0, 2, 1, 3)
    v = (xkv @ wv + bv).reshape(Bq, Sk, NUM_HEADS, D_K).transpose(0, 2, 1, 3)
    scores = jnp.einsum('bhqd,bhkd->bhqk', q, k) / math.sqrt(D_K)
    scores = jnp.where(mask[:, None, :, :] == 0, -1.0e9, scores)
    probs = jax.nn.softmax(scores, axis=-1)
    ctx = jnp.einsum('bhqk,bhkd->bhqd', probs, v)
    ctx = ctx.transpose(0, 2, 1, 3).reshape(Bq, Sq, D_MODEL)
    return ctx @ wo + bo


def _ref_ln(x, g, b):
    mu = jnp.mean(x, axis=-1, keepdims=True)
    var = jnp.mean((x - mu) ** 2, axis=-1, keepdims=True)
    return (x - mu) / jnp.sqrt(var + LN_EPS) * g + b


def decoder_layer_ref(x, enc, src_mask, tgt_mask, params):
    (wq1, bq1, wk1, bk1, wv1, bv1, wo1, bo1,
     wq2, bq2, wk2, bk2, wv2, bv2, wo2, bo2,
     w_fc1, b_fc1, w_fc2, b_fc2,
     g1, be1, g2, be2, g3, be3) = params
    a1 = _ref_mha(x, x, tgt_mask, wq1, bq1, wk1, bk1, wv1, bv1, wo1, bo1)
    x1 = _ref_ln(x + a1, g1, be1)
    a2 = _ref_mha(x1, enc, src_mask, wq2, bq2, wk2, bk2, wv2, bv2, wo2, bo2)
    x2 = _ref_ln(x1 + a2, g2, be2)
    h = jnp.maximum(x2 @ w_fc1 + b_fc1, 0.0)
    ff = h @ w_fc2 + b_fc2
    return _ref_ln(x2 + ff, g3, be3)


# ----------------------------- main ------------------------------------------
def _make_params(key):
    """Deterministic parameter init. Linear weights stored as (in, out) so the
    model computes y = x @ W + b (equivalent to torch Linear with W_t = W.T)."""
    shapes = (
        [(D_MODEL, D_MODEL), (1, D_MODEL)] * 4 +           # self-attn Wq..Wo
        [(D_MODEL, D_MODEL), (1, D_MODEL)] * 4 +           # cross-attn
        [(D_MODEL, D_FF), (1, D_FF), (D_FF, D_MODEL), (1, D_MODEL)] +  # ffn
        [(1, D_MODEL), (1, D_MODEL)] * 3                   # norms (gamma, beta)
    )
    keys = jax.random.split(key, len(shapes))
    params = []
    for i, (k, shp) in enumerate(zip(keys, shapes)):
        if i >= 20:  # layer norm params: gamma=1, beta=0 (PyTorch default)
            p = jnp.ones(shp, jnp.float32) if (i - 20) % 2 == 0 \
                else jnp.zeros(shp, jnp.float32)
        else:
            p = jax.random.normal(k, shp, jnp.float32) * 0.05
        params.append(p)
    return params


if __name__ == "__main__":
    root = jax.random.PRNGKey(0)
    k_x, k_enc, k_p = jax.random.split(root, 3)

    x = jax.random.normal(k_x, (B, S, D_MODEL), jnp.float32)
    enc = jax.random.normal(k_enc, (B, S_SRC, D_MODEL), jnp.float32)
    # causal target mask, all-ones source mask (float; 0 => masked)
    tgt_mask = jnp.tril(jnp.ones((S, S), jnp.float32))[None].repeat(B, axis=0)
    src_mask = jnp.ones((B, S, S_SRC), jnp.float32)

    params = _make_params(k_p)

    out = decoder_layer(x, enc, src_mask, tgt_mask, params)
    out = jax.block_until_ready(out)

    ref = decoder_layer_ref(x, enc, src_mask, tgt_mask, params)
    assert out.shape == (B, S, D_MODEL)
    # tolerance covers the reference's default (bf16-input) matmul precision
    assert jnp.allclose(out, ref, atol=5e-3, rtol=5e-3), "mismatch vs reference"

    print("KERNEL_OK")
</pallas_src>

<mosaic_0001>
module attributes {stable_mosaic.version = 11 : i64} {
  func.func @decoder_layer_kernel(%arg0: i32, %arg1: memref<16x32xf32, #tpu.memory_space<vmem>>, %arg2: memref<16x32xf32, #tpu.memory_space<vmem>>, %arg3: memref<16x16xf32, #tpu.memory_space<vmem>>, %arg4: memref<16x16xf32, #tpu.memory_space<vmem>>, %arg5: memref<335x32xf32, #tpu.memory_space<vmem>>, %arg6: memref<33x64xf32, #tpu.memory_space<vmem>>, %arg7: memref<16x32xf32, #tpu.memory_space<vmem>>) attributes {dimension_semantics = [#tpu.dimension_semantics<arbitrary>], iteration_bounds = array<i64: 1>, scalar_prefetch = 0 : i64, scratch_operands = 0 : i64, tpu.core_type = #tpu.core_type<tc>, window_params = [{pipeline_mode = #tpu.pipeline_mode<synchronous>, transform_indices = @transform_0, window_bounds = array<i64: 16, 32>}, {pipeline_mode = #tpu.pipeline_mode<synchronous>, transform_indices = @transform_1, window_bounds = array<i64: 16, 32>}, {pipeline_mode = #tpu.pipeline_mode<synchronous>, transform_indices = @transform_2, window_bounds = array<i64: 16, 16>}, {pipeline_mode = #tpu.pipeline_mode<synchronous>, transform_indices = @transform_3, window_bounds = array<i64: 16, 16>}, {pipeline_mode = #tpu.pipeline_mode<synchronous>, transform_indices = @transform_4, window_bounds = array<i64: 335, 32>}, {pipeline_mode = #tpu.pipeline_mode<synchronous>, transform_indices = @transform_5, window_bounds = array<i64: 33, 64>}, {pipeline_mode = #tpu.pipeline_mode<synchronous>, transform_indices = @transform_6, window_bounds = array<i64: 16, 32>}]} {
    %c0 = arith.constant 0 : index
    %c0_0 = arith.constant 0 : index
    %0 = vector.load %arg5[%c0, %c0_0] : memref<335x32xf32, #tpu.memory_space<vmem>>, vector<32x32xf32>
    %c32 = arith.constant 32 : index
    %c0_1 = arith.constant 0 : index
    %1 = vector.load %arg5[%c32, %c0_1] : memref<335x32xf32, #tpu.memory_space<vmem>>, vector<32x32xf32>
    %c64 = arith.constant 64 : index
    %c0_2 = arith.constant 0 : index
    %2 = vector.load %arg5[%c64, %c0_2] : memref<335x32xf32, #tpu.memory_space<vmem>>, vector<32x32xf32>
    %c96 = arith.constant 96 : index
    %c0_3 = arith.constant 0 : index
    %3 = vector.load %arg5[%c96, %c0_3] : memref<335x32xf32, #tpu.memory_space<vmem>>, vector<32x32xf32>
    %c128 = arith.constant 128 : index
    %c0_4 = arith.constant 0 : index
    %4 = vector.load %arg5[%c128, %c0_4] : memref<335x32xf32, #tpu.memory_space<vmem>>, vector<32x32xf32>
    %c160 = arith.constant 160 : index
    %c0_5 = arith.constant 0 : index
    %5 = vector.load %arg5[%c160, %c0_5] : memref<335x32xf32, #tpu.memory_space<vmem>>, vector<32x32xf32>
    %c192 = arith.constant 192 : index
    %c0_6 = arith.constant 0 : index
    %6 = vector.load %arg5[%c192, %c0_6] : memref<335x32xf32, #tpu.memory_space<vmem>>, vector<32x32xf32>
    %c224 = arith.constant 224 : index
    %c0_7 = arith.constant 0 : index
    %7 = vector.load %arg5[%c224, %c0_7] : memref<335x32xf32, #tpu.memory_space<vmem>>, vector<32x32xf32>
    %c256 = arith.constant 256 : index
    %c0_8 = arith.constant 0 : index
    %8 = vector.load %arg5[%c256, %c0_8] : memref<335x32xf32, #tpu.memory_space<vmem>>, vector<64x32xf32>
    %c320 = arith.constant 320 : index
    %c0_9 = arith.constant 0 : index
    %9 = vector.load %arg5[%c320, %c0_9] : memref<335x32xf32, #tpu.memory_space<vmem>>, vector<1x32xf32>
    %c321 = arith.constant 321 : index
    %c0_10 = arith.constant 0 : index
    %10 = vector.load %arg5[%c321, %c0_10] : memref<335x32xf32, #tpu.memory_space<vmem>>, vector<1x32xf32>
    %c322 = arith.constant 322 : index
    %c0_11 = arith.constant 0 : index
    %11 = vector.load %arg5[%c322, %c0_11] : memref<335x32xf32, #tpu.memory_space<vmem>>, vector<1x32xf32>
    %c323 = arith.constant 323 : index
    %c0_12 = arith.constant 0 : index
    %12 = vector.load %arg5[%c323, %c0_12] : memref<335x32xf32, #tpu.memory_space<vmem>>, vector<1x32xf32>
    %c324 = arith.constant 324 : index
    %c0_13 = arith.constant 0 : index
    %13 = vector.load %arg5[%c324, %c0_13] : memref<335x32xf32, #tpu.memory_space<vmem>>, vector<1x32xf32>
    %c325 = arith.constant 325 : index
    %c0_14 = arith.constant 0 : index
    %14 = vector.load %arg5[%c325, %c0_14] : memref<335x32xf32, #tpu.memory_space<vmem>>, vector<1x32xf32>
    %c326 = arith.constant 326 : index
    %c0_15 = arith.constant 0 : index
    %15 = vector.load %arg5[%c326, %c0_15] : memref<335x32xf32, #tpu.memory_space<vmem>>, vector<1x32xf32>
    %c327 = arith.constant 327 : index
    %c0_16 = arith.constant 0 : index
    %16 = vector.load %arg5[%c327, %c0_16] : memref<335x32xf32, #tpu.memory_space<vmem>>, vector<1x32xf32>
    %c328 = arith.constant 328 : index
    %c0_17 = arith.constant 0 : index
    %17 = vector.load %arg5[%c328, %c0_17] : memref<335x32xf32, #tpu.memory_space<vmem>>, vector<1x32xf32>
    %c329 = arith.constant 329 : index
    %c0_18 = arith.constant 0 : index
    %18 = vector.load %arg5[%c329, %c0_18] : memref<335x32xf32, #tpu.memory_space<vmem>>, vector<1x32xf32>
    %c330 = arith.constant 330 : index
    %c0_19 = arith.constant 0 : index
    %19 = vector.load %arg5[%c330, %c0_19] : memref<335x32xf32, #tpu.memory_space<vmem>>, vector<1x32xf32>
    %c331 = arith.constant 331 : index
    %c0_20 = arith.constant 0 : index
    %20 = vector.load %arg5[%c331, %c0_20] : memref<335x32xf32, #tpu.memory_space<vmem>>, vector<1x32xf32>
    %c332 = arith.constant 332 : index
    %c0_21 = arith.constant 0 : index
    %21 = vector.load %arg5[%c332, %c0_21] : memref<335x32xf32, #tpu.memory_space<vmem>>, vector<1x32xf32>
    %c333 = arith.constant 333 : index
    %c0_22 = arith.constant 0 : index
    %22 = vector.load %arg5[%c333, %c0_22] : memref<335x32xf32, #tpu.memory_space<vmem>>, vector<1x32xf32>
    %c334 = arith.constant 334 : index
    %c0_23 = arith.constant 0 : index
    %23 = vector.load %arg5[%c334, %c0_23] : memref<335x32xf32, #tpu.memory_space<vmem>>, vector<1x32xf32>
    %c0_24 = arith.constant 0 : index
    %c0_25 = arith.constant 0 : index
    %24 = vector.load %arg6[%c0_24, %c0_25] : memref<33x64xf32, #tpu.memory_space<vmem>>, vector<32x64xf32>
    %c32_26 = arith.constant 32 : index
    %c0_27 = arith.constant 0 : index
    %25 = vector.load %arg6[%c32_26, %c0_27] : memref<33x64xf32, #tpu.memory_space<vmem>>, vector<1x64xf32>
    %c0_28 = arith.constant 0 : index
    %c0_29 = arith.constant 0 : index
    %26 = vector.load %arg1[%c0_28, %c0_29] : memref<16x32xf32, #tpu.memory_space<vmem>>, vector<16x32xf32>
    %c0_30 = arith.constant 0 : index
    %c0_31 = arith.constant 0 : index
    %27 = vector.load %arg2[%c0_30, %c0_31] : memref<16x32xf32, #tpu.memory_space<vmem>>, vector<16x32xf32>
    %c0_32 = arith.constant 0 : index
    %c0_33 = arith.constant 0 : index
    %28 = vector.load %arg3[%c0_32, %c0_33] : memref<16x16xf32, #tpu.memory_space<vmem>>, vector<16x16xf32>
    %c0_34 = arith.constant 0 : index
    %c0_35 = arith.constant 0 : index
    %29 = vector.load %arg4[%c0_34, %c0_35] : memref<16x16xf32, #tpu.memory_space<vmem>>, vector<16x16xf32>
    %cst = arith.constant dense<0.000000e+00> : vector<16x32xf32>
    %30 = tpu.matmul %26, %0, %cst {dimension_numbers = #tpu.dot_dimension_numbers<[1], [0], [0], [1], [0, 0, 1, 1], [], []>} : vector<16x32xf32>, vector<32x32xf32>, vector<16x32xf32> -> vector<16x32xf32>
    %31 = vector.broadcast %9 : vector<1x32xf32> to vector<16x32xf32>
    %32 = arith.addf %30, %31 : vector<16x32xf32>
    %cst_36 = arith.constant dense<0.000000e+00> : vector<16x32xf32>
    %33 = tpu.matmul %26, %1, %cst_36 {dimension_numbers = #tpu.dot_dimension_numbers<[1], [0], [0], [1], [0, 0, 1, 1], [], []>} : vector<16x32xf32>, vector<32x32xf32>, vector<16x32xf32> -> vector<16x32xf32>
    %34 = vector.broadcast %10 : vector<1x32xf32> to vector<16x32xf32>
    %35 = arith.addf %33, %34 : vector<16x32xf32>
    %cst_37 = arith.constant dense<0.000000e+00> : vector<16x32xf32>
    %36 = tpu.matmul %26, %2, %cst_37 {dimension_numbers = #tpu.dot_dimension_numbers<[1], [0], [0], [1], [0, 0, 1, 1], [], []>} : vector<16x32xf32>, vector<32x32xf32>, vector<16x32xf32> -> vector<16x32xf32>
    %37 = vector.broadcast %11 : vector<1x32xf32> to vector<16x32xf32>
    %38 = arith.addf %36, %37 : vector<16x32xf32>
    %39 = vector.extract_strided_slice %32 {offsets = [0, 0], sizes = [16, 8], strides = [1, 1]} : vector<16x32xf32> to vector<16x8xf32>
    %40 = vector.extract_strided_slice %32 {offsets = [0, 8], sizes = [16, 8], strides = [1, 1]} : vector<16x32xf32> to vector<16x8xf32>
    %41 = vector.extract_strided_slice %32 {offsets = [0, 16], sizes = [16, 8], strides = [1, 1]} : vector<16x32xf32> to vector<16x8xf32>
    %42 = vector.extract_strided_slice %32 {offsets = [0, 24], sizes = [16, 8], strides = [1, 1]} : vector<16x32xf32> to vector<16x8xf32>
    %43 = vector.shape_cast %39 : vector<16x8xf32> to vector<1x16x8xf32>
    %44 = vector.shape_cast %40 : vector<16x8xf32> to vector<1x16x8xf32>
    %45 = vector.shape_cast %41 : vector<16x8xf32> to vector<1x16x8xf32>
    %46 = vector.shape_cast %42 : vector<16x8xf32> to vector<1x16x8xf32>
    %47 = tpu.concatenate %43, %44, %45, %46 in 0 : vector<1x16x8xf32>, vector<1x16x8xf32>, vector<1x16x8xf32>, vector<1x16x8xf32> -> vector<4x16x8xf32>
    %48 = vector.extract_strided_slice %35 {offsets = [0, 0], sizes = [16, 8], strides = [1, 1]} : vector<16x32xf32> to vector<16x8xf32>
    %49 = vector.extract_strided_slice %35 {offsets = [0, 8], sizes = [16, 8], strides = [1, 1]} : vector<16x32xf32> to vector<16x8xf32>
    %50 = vector.extract_strided_slice %35 {offsets = [0, 16], sizes = [16, 8], strides = [1, 1]} : vector<16x32xf32> to vector<16x8xf32>
    %51 = vector.extract_strided_slice %35 {offsets = [0, 24], sizes = [16, 8], strides = [1, 1]} : vector<16x32xf32> to vector<16x8xf32>
    %52 = vector.shape_cast %48 : vector<16x8xf32> to vector<1x16x8xf32>
    %53 = vector.shape_cast %49 : vector<16x8xf32> to vector<1x16x8xf32>
    %54 = vector.shape_cast %50 : vector<16x8xf32> to vector<1x16x8xf32>
    %55 = vector.shape_cast %51 : vector<16x8xf32> to vector<1x16x8xf32>
    %56 = tpu.concatenate %52, %53, %54, %55 in 0 : vector<1x16x8xf32>, vector<1x16x8xf32>, vector<1x16x8xf32>, vector<1x16x8xf32> -> vector<4x16x8xf32>
    %57 = vector.extract_strided_slice %38 {offsets = [0, 0], sizes = [16, 8], strides = [1, 1]} : vector<16x32xf32> to vector<16x8xf32>
    %58 = vector.extract_strided_slice %38 {offsets = [0, 8], sizes = [16, 8], strides = [1, 1]} : vector<16x32xf32> to vector<16x8xf32>
    %59 = vector.extract_strided_slice %38 {offsets = [0, 16], sizes = [16, 8], strides = [1, 1]} : vector<16x32xf32> to vector<16x8xf32>
    %60 = vector.extract_strided_slice %38 {offsets = [0, 24], sizes = [16, 8], strides = [1, 1]} : vector<16x32xf32> to vector<16x8xf32>
    %61 = vector.shape_cast %57 : vector<16x8xf32> to vector<1x16x8xf32>
    %62 = vector.shape_cast %58 : vector<16x8xf32> to vector<1x16x8xf32>
    %63 = vector.shape_cast %59 : vector<16x8xf32> to vector<1x16x8xf32>
    %64 = vector.shape_cast %60 : vector<16x8xf32> to vector<1x16x8xf32>
    %65 = tpu.concatenate %61, %62, %63, %64 in 0 : vector<1x16x8xf32>, vector<1x16x8xf32>, vector<1x16x8xf32>, vector<1x16x8xf32> -> vector<4x16x8xf32>
    "tpu.trace_start"() <{level = 10 : i32, message = "hqd,hkd->hqk"}> : () -> ()
    %cst_38 = arith.constant dense<0.000000e+00> : vector<4x16x16xf32>
    %66 = tpu.matmul %47, %56, %cst_38 {dimension_numbers = #tpu.dot_dimension_numbers<[2], [2], [1], [1], [0, 0, 0, 1, 1, 1], [0], [0]>} : vector<4x16x8xf32>, vector<4x16x8xf32>, vector<4x16x16xf32> -> vector<4x16x16xf32>
    "tpu.trace_stop"() : () -> ()
    %cst_39 = arith.constant 0.353553385 : f32
    %67 = vector.broadcast %cst_39 : f32 to vector<4x16x16xf32>
    %68 = arith.mulf %66, %67 : vector<4x16x16xf32>
    %69 = vector.shape_cast %28 : vector<16x16xf32> to vector<1x16x16xf32>
    %70 = vector.broadcast %69 : vector<1x16x16xf32> to vector<4x16x16xf32>
    %71 = arith.addf %68, %70 : vector<4x16x16xf32>
    %cst_40 = arith.constant dense<0xFF800000> : vector<4x16xf32>
    %72 = vector.multi_reduction <maximumf>, %71, %cst_40 [2] : vector<4x16x16xf32> to vector<4x16xf32>
    %73 = vector.shape_cast %72 : vector<4x16xf32> to vector<4x16x1xf32>
    %74 = vector.broadcast %73 : vector<4x16x1xf32> to vector<4x16x16xf32>
    %75 = arith.subf %71, %74 : vector<4x16x16xf32>
    %76 = math.exp %75 : vector<4x16x16xf32>
    %cst_41 = arith.constant dense<0.000000e+00> : vector<4x16xf32>
    %77 = vector.multi_reduction <add>, %76, %cst_41 [2] : vector<4x16x16xf32> to vector<4x16xf32>
    %78 = vector.shape_cast %77 : vector<4x16xf32> to vector<4x16x1xf32>
    %79 = vector.broadcast %78 : vector<4x16x1xf32> to vector<4x16x16xf32>
    %80 = arith.divf %76, %79 : vector<4x16x16xf32>
    "tpu.trace_start"() <{level = 10 : i32, message = "hqk,hkd->hqd"}> : () -> ()
    %cst_42 = arith.constant dense<0.000000e+00> : vector<4x16x8xf32>
    %81 = tpu.matmul %80, %65, %cst_42 {dimension_numbers = #tpu.dot_dimension_numbers<[2], [1], [1], [2], [0, 0, 0, 1, 1, 2], [0], [0]>} : vector<4x16x16xf32>, vector<4x16x8xf32>, vector<4x16x8xf32> -> vector<4x16x8xf32>
    "tpu.trace_stop"() : () -> ()
    %82 = vector.shape_cast %3 : vector<32x32xf32> to vector<4x8x32xf32>
    "tpu.trace_start"() <{level = 10 : i32, message = "hqd,hde->hqe"}> : () -> ()
    %cst_43 = arith.constant dense<0.000000e+00> : vector<4x16x32xf32>
    %83 = tpu.matmul %81, %82, %cst_43 {dimension_numbers = #tpu.dot_dimension_numbers<[2], [1], [1], [2], [0, 0, 0, 1, 1, 2], [0], [0]>} : vector<4x16x8xf32>, vector<4x8x32xf32>, vector<4x16x32xf32> -> vector<4x16x32xf32>
    "tpu.trace_stop"() : () -> ()
    %cst_44 = arith.constant dense<0.000000e+00> : vector<16x32xf32>
    %84 = vector.multi_reduction <add>, %83, %cst_44 [0] : vector<4x16x32xf32> to vector<16x32xf32>
    %85 = vector.broadcast %12 : vector<1x32xf32> to vector<16x32xf32>
    %86 = arith.addf %84, %85 : vector<16x32xf32>
    %87 = arith.addf %26, %86 : vector<16x32xf32>
    %cst_45 = arith.constant dense<0.000000e+00> : vector<16xf32>
    %88 = vector.multi_reduction <add>, %87, %cst_45 [1] : vector<16x32xf32> to vector<16xf32>
    %89 = vector.shape_cast %88 : vector<16xf32> to vector<16x1xf32>
    %cst_46 = arith.constant 3.200000e+01 : f32
    %90 = vector.broadcast %cst_46 : f32 to vector<16x1xf32>
    %91 = arith.divf %89, %90 : vector<16x1xf32>
    %92 = vector.broadcast %91 : vector<16x1xf32> to vector<16x32xf32>
    %93 = arith.subf %87, %92 : vector<16x32xf32>
    %94 = arith.mulf %93, %93 : vector<16x32xf32>
    %cst_47 = arith.constant dense<0.000000e+00> : vector<16xf32>
    %95 = vector.multi_reduction <add>, %94, %cst_47 [1] : vector<16x32xf32> to vector<16xf32>
    %96 = vector.shape_cast %95 : vector<16xf32> to vector<16x1xf32>
    %cst_48 = arith.constant 3.200000e+01 : f32
    %97 = vector.broadcast %cst_48 : f32 to vector<16x1xf32>
    %98 = arith.divf %96, %97 : vector<16x1xf32>
    %99 = vector.broadcast %91 : vector<16x1xf32> to vector<16x32xf32>
    %100 = arith.subf %87, %99 : vector<16x32xf32>
    %cst_49 = arith.constant 9.99999974E-6 : f32
    %101 = vector.broadcast %cst_49 : f32 to vector<16x1xf32>
    %102 = arith.addf %98, %101 : vector<16x1xf32>
    %103 = math.rsqrt %102 : vector<16x1xf32>
    %104 = vector.broadcast %103 : vector<16x1xf32> to vector<16x32xf32>
    %105 = arith.mulf %100, %104 : vector<16x32xf32>
    %106 = vector.broadcast %18 : vector<1x32xf32> to vector<16x32xf32>
    %107 = arith.mulf %105, %106 : vector<16x32xf32>
    %108 = vector.broadcast %19 : vector<1x32xf32> to vector<16x32xf32>
    %109 = arith.addf %107, %108 : vector<16x32xf32>
    %cst_50 = arith.constant dense<0.000000e+00> : vector<16x32xf32>
    %110 = tpu.matmul %109, %4, %cst_50 {dimension_numbers = #tpu.dot_dimension_numbers<[1], [0], [0], [1], [0, 0, 1, 1], [], []>} : vector<16x32xf32>, vector<32x32xf32>, vector<16x32xf32> -> vector<16x32xf32>
    %111 = vector.broadcast %13 : vector<1x32xf32> to vector<16x32xf32>
    %112 = arith.addf %110, %111 : vector<16x32xf32>
    %cst_51 = arith.constant dense<0.000000e+00> : vector<16x32xf32>
    %113 = tpu.matmul %27, %5, %cst_51 {dimension_numbers = #tpu.dot_dimension_numbers<[1], [0], [0], [1], [0, 0, 1, 1], [], []>} : vector<16x32xf32>, vector<32x32xf32>, vector<16x32xf32> -> vector<16x32xf32>
    %114 = vector.broadcast %14 : vector<1x32xf32> to vector<16x32xf32>
    %115 = arith.addf %113, %114 : vector<16x32xf32>
    %cst_52 = arith.constant dense<0.000000e+00> : vector<16x32xf32>
    %116 = tpu.matmul %27, %6, %cst_52 {dimension_numbers = #tpu.dot_dimension_numbers<[1], [0], [0], [1], [0, 0, 1, 1], [], []>} : vector<16x32xf32>, vector<32x32xf32>, vector<16x32xf32> -> vector<16x32xf32>
    %117 = vector.broadcast %15 : vector<1x32xf32> to vector<16x32xf32>
    %118 = arith.addf %116, %117 : vector<16x32xf32>
    %119 = vector.extract_strided_slice %112 {offsets = [0, 0], sizes = [16, 8], strides = [1, 1]} : vector<16x32xf32> to vector<16x8xf32>
    %120 = vector.extract_strided_slice %112 {offsets = [0, 8], sizes = [16, 8], strides = [1, 1]} : vector<16x32xf32> to vector<16x8xf32>
    %121 = vector.extract_strided_slice %112 {offsets = [0, 16], sizes = [16, 8], strides = [1, 1]} : vector<16x32xf32> to vector<16x8xf32>
    %122 = vector.extract_strided_slice %112 {offsets = [0, 24], sizes = [16, 8], strides = [1, 1]} : vector<16x32xf32> to vector<16x8xf32>
    %123 = vector.shape_cast %119 : vector<16x8xf32> to vector<1x16x8xf32>
    %124 = vector.shape_cast %120 : vector<16x8xf32> to vector<1x16x8xf32>
    %125 = vector.shape_cast %121 : vector<16x8xf32> to vector<1x16x8xf32>
    %126 = vector.shape_cast %122 : vector<16x8xf32> to vector<1x16x8xf32>
    %127 = tpu.concatenate %123, %124, %125, %126 in 0 : vector<1x16x8xf32>, vector<1x16x8xf32>, vector<1x16x8xf32>, vector<1x16x8xf32> -> vector<4x16x8xf32>
    %128 = vector.extract_strided_slice %115 {offsets = [0, 0], sizes = [16, 8], strides = [1, 1]} : vector<16x32xf32> to vector<16x8xf32>
    %129 = vector.extract_strided_slice %115 {offsets = [0, 8], sizes = [16, 8], strides = [1, 1]} : vector<16x32xf32> to vector<16x8xf32>
    %130 = vector.extract_strided_slice %115 {offsets = [0, 16], sizes = [16, 8], strides = [1, 1]} : vector<16x32xf32> to vector<16x8xf32>
    %131 = vector.extract_strided_slice %115 {offsets = [0, 24], sizes = [16, 8], strides = [1, 1]} : vector<16x32xf32> to vector<16x8xf32>
    %132 = vector.shape_cast %128 : vector<16x8xf32> to vector<1x16x8xf32>
    %133 = vector.shape_cast %129 : vector<16x8xf32> to vector<1x16x8xf32>
    %134 = vector.shape_cast %130 : vector<16x8xf32> to vector<1x16x8xf32>
    %135 = vector.shape_cast %131 : vector<16x8xf32> to vector<1x16x8xf32>
    %136 = tpu.concatenate %132, %133, %134, %135 in 0 : vector<1x16x8xf32>, vector<1x16x8xf32>, vector<1x16x8xf32>, vector<1x16x8xf32> -> vector<4x16x8xf32>
    %137 = vector.extract_strided_slice %118 {offsets = [0, 0], sizes = [16, 8], strides = [1, 1]} : vector<16x32xf32> to vector<16x8xf32>
    %138 = vector.extract_strided_slice %118 {offsets = [0, 8], sizes = [16, 8], strides = [1, 1]} : vector<16x32xf32> to vector<16x8xf32>
    %139 = vector.extract_strided_slice %118 {offsets = [0, 16], sizes = [16, 8], strides = [1, 1]} : vector<16x32xf32> to vector<16x8xf32>
    %140 = vector.extract_strided_slice %118 {offsets = [0, 24], sizes = [16, 8], strides = [1, 1]} : vector<16x32xf32> to vector<16x8xf32>
    %141 = vector.shape_cast %137 : vector<16x8xf32> to vector<1x16x8xf32>
    %142 = vector.shape_cast %138 : vector<16x8xf32> to vector<1x16x8xf32>
    %143 = vector.shape_cast %139 : vector<16x8xf32> to vector<1x16x8xf32>
    %144 = vector.shape_cast %140 : vector<16x8xf32> to vector<1x16x8xf32>
    %145 = tpu.concatenate %141, %142, %143, %144 in 0 : vector<1x16x8xf32>, vector<1x16x8xf32>, vector<1x16x8xf32>, vector<1x16x8xf32> -> vector<4x16x8xf32>
    "tpu.trace_start"() <{level = 10 : i32, message = "hqd,hkd->hqk"}> : () -> ()
    %cst_53 = arith.constant dense<0.000000e+00> : vector<4x16x16xf32>
    %146 = tpu.matmul %127, %136, %cst_53 {dimension_numbers = #tpu.dot_dimension_numbers<[2], [2], [1], [1], [0, 0, 0, 1, 1, 1], [0], [0]>} : vector<4x16x8xf32>, vector<4x16x8xf32>, vector<4x16x16xf32> -> vector<4x16x16xf32>
    "tpu.trace_stop"() : () -> ()
    %cst_54 = arith.constant 0.353553385 : f32
    %147 = vector.broadcast %cst_54 : f32 to vector<4x16x16xf32>
    %148 = arith.mulf %146, %147 : vector<4x16x16xf32>
    %149 = vector.shape_cast %29 : vector<16x16xf32> to vector<1x16x16xf32>
    %150 = vector.broadcast %149 : vector<1x16x16xf32> to vector<4x16x16xf32>
    %151 = arith.addf %148, %150 : vector<4x16x16xf32>
    %cst_55 = arith.constant dense<0xFF800000> : vector<4x16xf32>
    %152 = vector.multi_reduction <maximumf>, %151, %cst_55 [2] : vector<4x16x16xf32> to vector<4x16xf32>
    %153 = vector.shape_cast %152 : vector<4x16xf32> to vector<4x16x1xf32>
    %154 = vector.broadcast %153 : vector<4x16x1xf32> to vector<4x16x16xf32>
    %155 = arith.subf %151, %154 : vector<4x16x16xf32>
    %156 = math.exp %155 : vector<4x16x16xf32>
    %cst_56 = arith.constant dense<0.000000e+00> : vector<4x16xf32>
    %157 = vector.multi_reduction <add>, %156, %cst_56 [2] : vector<4x16x16xf32> to vector<4x16xf32>
    %158 = vector.shape_cast %157 : vector<4x16xf32> to vector<4x16x1xf32>
    %159 = vector.broadcast %158 : vector<4x16x1xf32> to vector<4x16x16xf32>
    %160 = arith.divf %156, %159 : vector<4x16x16xf32>
    "tpu.trace_start"() <{level = 10 : i32, message = "hqk,hkd->hqd"}> : () -> ()
    %cst_57 = arith.constant dense<0.000000e+00> : vector<4x16x8xf32>
    %161 = tpu.matmul %160, %145, %cst_57 {dimension_numbers = #tpu.dot_dimension_numbers<[2], [1], [1], [2], [0, 0, 0, 1, 1, 2], [0], [0]>} : vector<4x16x16xf32>, vector<4x16x8xf32>, vector<4x16x8xf32> -> vector<4x16x8xf32>
    "tpu.trace_stop"() : () -> ()
    %162 = vector.shape_cast %7 : vector<32x32xf32> to vector<4x8x32xf32>
    "tpu.trace_start"() <{level = 10 : i32, message = "hqd,hde->hqe"}> : () -> ()
    %cst_58 = arith.constant dense<0.000000e+00> : vector<4x16x32xf32>
    %163 = tpu.matmul %161, %162, %cst_58 {dimension_numbers = #tpu.dot_dimension_numbers<[2], [1], [1], [2], [0, 0, 0, 1, 1, 2], [0], [0]>} : vector<4x16x8xf32>, vector<4x8x32xf32>, vector<4x16x32xf32> -> vector<4x16x32xf32>
    "tpu.trace_stop"() : () -> ()
    %cst_59 = arith.constant dense<0.000000e+00> : vector<16x32xf32>
    %164 = vector.multi_reduction <add>, %163, %cst_59 [0] : vector<4x16x32xf32> to vector<16x32xf32>
    %165 = vector.broadcast %16 : vector<1x32xf32> to vector<16x32xf32>
    %166 = arith.addf %164, %165 : vector<16x32xf32>
    %167 = arith.addf %109, %166 : vector<16x32xf32>
    %cst_60 = arith.constant dense<0.000000e+00> : vector<16xf32>
    %168 = vector.multi_reduction <add>, %167, %cst_60 [1] : vector<16x32xf32> to vector<16xf32>
    %169 = vector.shape_cast %168 : vector<16xf32> to vector<16x1xf32>
    %cst_61 = arith.constant 3.200000e+01 : f32
    %170 = vector.broadcast %cst_61 : f32 to vector<16x1xf32>
    %171 = arith.divf %169, %170 : vector<16x1xf32>
    %172 = vector.broadcast %171 : vector<16x1xf32> to vector<16x32xf32>
    %173 = arith.subf %167, %172 : vector<16x32xf32>
    %174 = arith.mulf %173, %173 : vector<16x32xf32>
    %cst_62 = arith.constant dense<0.000000e+00> : vector<16xf32>
    %175 = vector.multi_reduction <add>, %174, %cst_62 [1] : vector<16x32xf32> to vector<16xf32>
    %176 = vector.shape_cast %175 : vector<16xf32> to vector<16x1xf32>
    %cst_63 = arith.constant 3.200000e+01 : f32
    %177 = vector.broadcast %cst_63 : f32 to vector<16x1xf32>
    %178 = arith.divf %176, %177 : vector<16x1xf32>
    %179 = vector.broadcast %171 : vector<16x1xf32> to vector<16x32xf32>
    %180 = arith.subf %167, %179 : vector<16x32xf32>
    %cst_64 = arith.constant 9.99999974E-6 : f32
    %181 = vector.broadcast %cst_64 : f32 to vector<16x1xf32>
    %182 = arith.addf %178, %181 : vector<16x1xf32>
    %183 = math.rsqrt %182 : vector<16x1xf32>
    %184 = vector.broadcast %183 : vector<16x1xf32> to vector<16x32xf32>
    %185 = arith.mulf %180, %184 : vector<16x32xf32>
    %186 = vector.broadcast %20 : vector<1x32xf32> to vector<16x32xf32>
    %187 = arith.mulf %185, %186 : vector<16x32xf32>
    %188 = vector.broadcast %21 : vector<1x32xf32> to vector<16x32xf32>
    %189 = arith.addf %187, %188 : vector<16x32xf32>
    %cst_65 = arith.constant dense<0.000000e+00> : vector<16x64xf32>
    %190 = tpu.matmul %189, %24, %cst_65 {dimension_numbers = #tpu.dot_dimension_numbers<[1], [0], [0], [1], [0, 0, 1, 1], [], []>} : vector<16x32xf32>, vector<32x64xf32>, vector<16x64xf32> -> vector<16x64xf32>
    %191 = vector.broadcast %25 : vector<1x64xf32> to vector<16x64xf32>
    %192 = arith.addf %190, %191 : vector<16x64xf32>
    %cst_66 = arith.constant 0.000000e+00 : f32
    %193 = vector.broadcast %cst_66 : f32 to vector<16x64xf32>
    %194 = arith.maximumf %192, %193 : vector<16x64xf32>
    %cst_67 = arith.constant dense<0.000000e+00> : vector<16x32xf32>
    %195 = tpu.matmul %194, %8, %cst_67 {dimension_numbers = #tpu.dot_dimension_numbers<[1], [0], [0], [1], [0, 0, 1, 1], [], []>} : vector<16x64xf32>, vector<64x32xf32>, vector<16x32xf32> -> vector<16x32xf32>
    %196 = vector.broadcast %17 : vector<1x32xf32> to vector<16x32xf32>
    %197 = arith.addf %195, %196 : vector<16x32xf32>
    %198 = arith.addf %189, %197 : vector<16x32xf32>
    %cst_68 = arith.constant dense<0.000000e+00> : vector<16xf32>
    %199 = vector.multi_reduction <add>, %198, %cst_68 [1] : vector<16x32xf32> to vector<16xf32>
    %200 = vector.shape_cast %199 : vector<16xf32> to vector<16x1xf32>
    %cst_69 = arith.constant 3.200000e+01 : f32
    %201 = vector.broadcast %cst_69 : f32 to vector<16x1xf32>
    %202 = arith.divf %200, %201 : vector<16x1xf32>
    %203 = vector.broadcast %202 : vector<16x1xf32> to vector<16x32xf32>
    %204 = arith.subf %198, %203 : vector<16x32xf32>
    %205 = arith.mulf %204, %204 : vector<16x32xf32>
    %cst_70 = arith.constant dense<0.000000e+00> : vector<16xf32>
    %206 = vector.multi_reduction <add>, %205, %cst_70 [1] : vector<16x32xf32> to vector<16xf32>
    %207 = vector.shape_cast %206 : vector<16xf32> to vector<16x1xf32>
    %cst_71 = arith.constant 3.200000e+01 : f32
    %208 = vector.broadcast %cst_71 : f32 to vector<16x1xf32>
    %209 = arith.divf %207, %208 : vector<16x1xf32>
    %210 = vector.broadcast %202 : vector<16x1xf32> to vector<16x32xf32>
    %211 = arith.subf %198, %210 : vector<16x32xf32>
    %cst_72 = arith.constant 9.99999974E-6 : f32
    %212 = vector.broadcast %cst_72 : f32 to vector<16x1xf32>
    %213 = arith.addf %209, %212 : vector<16x1xf32>
    %214 = math.rsqrt %213 : vector<16x1xf32>
    %215 = vector.broadcast %214 : vector<16x1xf32> to vector<16x32xf32>
    %216 = arith.mulf %211, %215 : vector<16x32xf32>
    %217 = vector.broadcast %22 : vector<1x32xf32> to vector<16x32xf32>
    %218 = arith.mulf %216, %217 : vector<16x32xf32>
    %219 = vector.broadcast %23 : vector<1x32xf32> to vector<16x32xf32>
    %220 = arith.addf %218, %219 : vector<16x32xf32>
    %c0_73 = arith.constant 0 : index
    %c0_74 = arith.constant 0 : index
    %221 = vector.load %arg7[%c0_73, %c0_74] : memref<16x32xf32, #tpu.memory_space<vmem>>, vector<16x32xf32>
    tpu.vector_store %arg7[%c0_73, %c0_74], %220 {strides = array<i32>} : memref<16x32xf32, #tpu.memory_space<vmem>>, vector<16x32xf32>,
    return
  }
  func.func @transform_0(%arg0: i32) -> (i32, i32) {
    %c0_i32 = arith.constant 0 : i32
    %c0_i32_0 = arith.constant 0 : i32
    %c0_i32_1 = arith.constant 0 : i32
    return %c0_i32, %c0_i32_0 : i32, i32
  }
  func.func @transform_1(%arg0: i32) -> (i32, i32) {
    %c0_i32 = arith.constant 0 : i32
    %c0_i32_0 = arith.constant 0 : i32
    %c0_i32_1 = arith.constant 0 : i32
    return %c0_i32, %c0_i32_0 : i32, i32
  }
  func.func @transform_2(%arg0: i32) -> (i32, i32) {
    %c0_i32 = arith.constant 0 : i32
    %c0_i32_0 = arith.constant 0 : i32
    %c0_i32_1 = arith.constant 0 : i32
    return %c0_i32, %c0_i32_0 : i32, i32
  }
  func.func @transform_3(%arg0: i32) -> (i32, i32) {
    %c0_i32 = arith.constant 0 : i32
    %c0_i32_0 = arith.constant 0 : i32
    %c0_i32_1 = arith.constant 0 : i32
    return %c0_i32, %c0_i32_0 : i32, i32
  }
  func.func @transform_4(%arg0: i32) -> (i32, i32) {
    %c0_i32 = arith.constant 0 : i32
    %c0_i32_0 = arith.constant 0 : i32
    %c0_i32_1 = arith.constant 0 : i32
    return %c0_i32, %c0_i32_0 : i32, i32
  }
  func.func @transform_5(%arg0: i32) -> (i32, i32) {
    %c0_i32 = arith.constant 0 : i32
    %c0_i32_0 = arith.constant 0 : i32
    %c0_i32_1 = arith.constant 0 : i32
    return %c0_i32, %c0_i32_0 : i32, i32
  }
  func.func @transform_6(%arg0: i32) -> (i32, i32) {
    %c0_i32 = arith.constant 0 : i32
    %c0_i32_0 = arith.constant 0 : i32
    %c0_i32_1 = arith.constant 0 : i32
    return %c0_i32, %c0_i32_0 : i32, i32
  }
}

</mosaic_0001>

<bundles_post_ra>
// kernel: tpu_custom_call.1
= control target key start
LH: loop header
LB: loop body
LE: loop exit
PB: predicated region body
PF: predicated region fallthrough
CT: control target
= control target key end

     0   :  { %vm93_vm0 = vcmask 261120   ;;  %s2670_s0 = inlined_call_operand.vmem [shape: f32[16,32], index: 0, kind: input, shape index: {}]   ;;  %s2671_s1 = inlined_call_operand.vmem [shape: f32[16,32], index: 1, kind: input, shape index: {}]   ;;  %s2672_s2 = inlined_call_operand.vmem [shape: f32[16,16], index: 2, kind: input, shape index: {}]   ;;  %s2673_s3 = inlined_call_operand.vmem [shape: f32[16,16], index: 3, kind: input, shape index: {}]   ;;  %s2674_s4 = inlined_call_operand.vmem [shape: f32[335,32], index: 4, kind: input, shape index: {}]   ;;  %s2675_s5 = inlined_call_operand.vmem [shape: f32[33,64], index: 5, kind: input, shape index: {}]   ;;  %s2676_s6 = inlined_call_operand.hbm [shape: f32[16,32], index: 6, kind: output, shape index: {}]  }
   0x1   :  { %v27_v0 = vld [vmem:[%s2674_s4 + $0x18] sm:$0xff]  ;;  %v26_v2 = vld [vmem:[%s2674_s4 + $0x10] sm:$0xff]  ;;  %v25_v4 = vld [vmem:[%s2674_s4 + $0x8] sm:$0xff] }
   0x2   :  { %v31_v1 = vld [vmem:[%s2674_s4 + $0x38] sm:$0xff]  ;;  %112 = vmatpush.msra.mxu0 %v27_v0  ;;  %v30_v3 = vld [vmem:[%s2674_s4 + $0x30] sm:$0xff]  ;;  %v29_v5 = vld [vmem:[%s2674_s4 + $0x28] sm:$0xff] }
   0x3   :  { %136 = vmatpush.msra.mxu1 %v31_v1  ;;  %v24_v6 = vld [vmem:[%s2674_s4] sm:$0xff] }
   0x4   :  { %113 = vmatpush.msra.mxu0 %v26_v2  ;;  %v28_v7 = vld [vmem:[%s2674_s4 + $0x20] sm:$0xff] }
   0x5   :  { %137 = vmatpush.msra.mxu1 %v30_v3  ;;  %v2067_v8 = vld [vmem:[%s2670_s0] sm:$0xff] }
   0x6   :  { %114 = vmatpush.msra.mxu0 %v25_v4 }
   0x7   :  { %138 = vmatpush.msra.mxu1 %v29_v5 }
   0x8   :  { %115 = vmatpush.msra.mxu0 %v24_v6 }
   0x9   :  { %139 = vmatpush.msra.mxu1 %v28_v7  ;;  %1761 = vmatmul.msk.f32.vlgmr.msra.gmra.mxu0 %vm93_vm0, %v2067_v8 }
   0xa   :  { %1763 = vmatmul.msk.f32.vlgmr.msra.gmra.mxu1 %vm93_vm0, %v2067_v8 }
   0xb   :  { %11 = vsyncpa [#allocation3], 0  ;;  %v2076_v9 = vld [vmem:[%s2670_s0 + $0x8] sm:$0xff]  ;;  %v1878_v10 = vld [vmem:[%s2674_s4 + $0x140] ss:$0 sm:$0xff]  ;;  %s1998_s19 = smov 104  }
   0xc   :  { %v1879_v14 = vld [vmem:[%s2674_s4 + $0x141] ss:$0 sm:$0xff]  ;;  %vm219_vm1 = vcmask 64512   ;;  %s1999_s0 = smov 120   ;;  %s2000_s22 = smov 112   ;;  %v35_v20 = vld [vmem:[%s2674_s4 + $0x58] sm:$0xff] }
   0xd   :  { %v34_v21 = vld [vmem:[%s2674_s4 + $0x50] sm:$0xff]  ;;  %160 = vmatpush.msra.mxu2 %v35_v20  ;;  %v33_v22 = vld [vmem:[%s2674_s4 + $0x48] sm:$0xff]  ;;  %v32_v23 = vld [vmem:[%s2674_s4 + $0x40] sm:$0xff]  ;;  %vm360_vm2 = vcmask 130048   ;;  %s2002_s7 = smov [#allocation2]   ;;  %s1749_s11 = sshll.u32 %s2676_s6, 4  ;;  %s1750_s11 = int_to_ptr.hbm [resolvable:$true] %s1749_s11 }
   0xe   :  { %v88_v35 = vld [vmem:[%s2672_s2] sm:$0xff]  ;;  %v89_v42 = vld [vmem:[%s2672_s2 + $0x8] sm:$0xff]  ;;  %s1747_s8 = sshll.u32 %s2002_s7, 4  ;;  %s2004_s12 = smov 8   ;;  %s1748_s8 = int_to_ptr.vmem [resolvable:$true] %s1747_s8 }
   0xf   :  { %161 = vmatpush.msra.mxu2 %v34_v21  ;;  %v1880_v47 = vld [vmem:[%s2674_s4 + $0x142] ss:$0 sm:$0xff] }
  0x11   :  { %1762 = vmatmul.msk.f32.gmra.mxu0 %vm93_vm0, %v2076_v9  ;;  %162 = vmatpush.msra.mxu2 %v33_v22 }
  0x12   :  { %1764 = vmatmul.msk.f32.gmra.mxu1 %vm93_vm0, %v2076_v9 }
  0x13   :  { %163 = vmatpush.msra.mxu2 %v32_v23 }
  0x14   :  { %1765 = vmatmul.msk.f32.vlgmr.msra.gmra.mxu2 %vm93_vm0, %v2067_v8 }
  0x1c   :  { %1766 = vmatmul.msk.f32.gmra.mxu2 %vm93_vm0, %v2076_v9 }
  0x86   :  { %v117_v11 = vpop.f32.mrf.mxu0 }
  0x87   :  { %v141_v12 = vpop.f32.mrf.mxu1  ;;  %v118_v13 = vadd.f32 %v1878_v10, %v117_v11 }
  0x88   :  { %v142_v19 = vadd.f32 %v1879_v14, %v141_v12 }
  0x89   :  { %181 = vrot.lane.b32.xlu1 %v118_v13, %s1998_s19 }
  0x8e   :  { %v120_v15 = vpop.f32.mrf.mxu0 }
  0x8f   :  { %v144_v16 = vpop.f32.mrf.mxu1  ;;  %v121_v17 = vadd.f32 %v1878_v10, %v120_v15 }
  0x90   :  { %v145_v18 = vadd.f32 %v1879_v14, %v144_v16 }
  0x91   :  { %183 = vrot.lane.b32.xlu2 %v121_v17, %s1998_s19 }
  0x92   :  { %197 = vrot.lane.b32.xlu0 %v145_v18, %s1998_s19  ;;  %1767 = vmatpush.xpose.msk.msra.mxu3 %vm219_vm1, %v145_v18 }
  0x93   :  { %189 = vrot.lane.b32.xlu1 %v145_v18, %s1999_s0 }
  0x96   :  { %1768 = vmatpush.xpose.msk.msra.mxu3 %vm219_vm1, %v142_v19 }
  0x97   :  { %v165_v46 = vpop.f32.mrf.mxu2 }
  0x98   :  { %v166_v49 = vadd.f32 %v1880_v47, %v165_v46 }
  0x99   :  { %1769 = vmatmul.msk.f32.vlgmr.msra.gmra.mxu3 %vm219_vm1, %v118_v13  ;;  %193 = vrot.lane.b32.xlu2 %v145_v18, %s2000_s22 }
  0x9a   :  { %195 = vrot.lane.b32.xlu0 %v142_v19, %s1998_s19 }
  0x9b   :  { %191 = vrot.lane.b32.xlu1 %v142_v19, %s2000_s22 }
  0x9f   :  { %v168_v48 = vpop.f32.mrf.mxu2 }
  0xa0   :  { %v169_v50 = vadd.f32 %v1880_v47, %v168_v48 }
  0xa1   :  { %1770 = vmatmul.msk.f32.gmra.mxu3 %vm219_vm1, %v121_v17  ;;  %173 = vrot.lane.b32.xlu2 %v118_v13, %s1999_s0 }
  0xa2   :  { %187 = vrot.lane.b32.xlu0 %v142_v19, %s1999_s0  ;;  %573 = vmatpush.msrb.mxu3 %v169_v50  ;;  %v2143_v51 = vpack.i.bf16 %v166_v49, %v169_v50 }
  0xa3   :  { %175 = vrot.lane.b32.xlu1 %v121_v17, %s1999_s0 }
  0xa4   :  { %574 = vmatpush.msrb.mxu3 %v166_v49 }
  0xa9   :  { %179 = vrot.lane.b32.xlu2 %v121_v17, %s2000_s22 }
  0xaa   :  { %177 = vrot.lane.b32.xlu0 %v118_v13, %s2000_s22 }
  0xeb   :  { %v184_v24 = vpop.permute.xlu2 %183 }
  0xf3   :  { %v194_v25 = vpop.permute.xlu2 %193 }
  0xf4   :  { %1775 = vmatpush.xpose.msk.msrb.mxu1 %vm219_vm1, %v194_v25 }
  0xfb   :  { %v182_v26 = vpop.permute.xlu1 %181  ;;  %v174_v32 = vpop.permute.xlu2 %173 }
 0x103   :  { %v180_v40 = vpop.permute.xlu2 %179 }
 0x104   :  { %v198_v27 = vpop.permute.xlu0 %197 }
 0x105   :  { %v190_v28 = vpop.permute.xlu1 %189  ;;  %1779 = vmatpush.xpose.msk.msrb.mxu2 %vm219_vm1, %v198_v27 }
 0x106   :  { %1771 = vmatpush.xpose.msk.msrb.mxu0 %vm219_vm1, %v190_v28 }
 0x10c   :  { %v196_v29 = vpop.permute.xlu0 %195 }
 0x10d   :  { %v192_v30 = vpop.permute.xlu1 %191  ;;  %1780 = vmatpush.xpose.msk.msrb.mxu2 %vm219_vm1, %v196_v29 }
 0x10e   :  { %1776 = vmatpush.xpose.msk.msrb.mxu1 %vm219_vm1, %v192_v30 }
 0x110   :  { %1781 = vmatmul.msk.f32.vlgmr.msrb.gmra.mxu2 %vm219_vm1, %v182_v26 }
 0x114   :  { %v188_v31 = vpop.permute.xlu0 %187 }
 0x115   :  { %1772 = vmatpush.xpose.msk.msrb.mxu0 %vm219_vm1, %v188_v31  ;;  %v176_v37 = vpop.permute.xlu1 %175 }
 0x118   :  { %1773 = vmatmul.msk.f32.vlgmr.msrb.gmra.mxu0 %vm219_vm1, %v174_v32  ;;  %1782 = vmatmul.msk.f32.gmra.mxu2 %vm219_vm1, %v184_v24 }
 0x11c   :  { %v178_v33 = vpop.permute.xlu0 %177  ;;  %v245_v34 = vpop.f32.mrf.mxu3 }
 0x11d   :  { %v344_v36 = vmul.f32 0.35355338, %v245_v34  ;;  %1777 = vmatmul.msk.f32.vlgmr.msrb.gmra.mxu1 %vm219_vm1, %v178_v33 }
 0x11f   :  { %v352_v38 = vadd.f32 %v344_v36, %v88_v35 }
 0x120   :  { %1774 = vmatmul.msk.f32.gmra.mxu0 %vm219_vm1, %v176_v37 }
 0x121   :  { %v361_v39 = vsel %vm360_vm2, %v352_v38, -inf }
 0x122   :  { %362 = vmax.xlane.f32.xlu0 %v361_v39 }
 0x124   :  { %v248_v41 = vpop.f32.mrf.mxu3 }
 0x125   :  { %v345_v43 = vmul.f32 0.35355338, %v248_v41  ;;  %1778 = vmatmul.msk.f32.gmra.mxu1 %vm219_vm1, %v180_v40 }
 0x127   :  { %v353_v44 = vadd.f32 %v345_v43, %v89_v42 }
 0x129   :  { %v364_v45 = vsel %vm360_vm2, %v353_v44, -inf }
 0x12a   :  { %365 = vmax.xlane.f32.xlu2 %v364_v45 }
 0x193   :  { %v338_v52 = vpop.f32.mrf.mxu2 }
 0x194   :  { %v350_v53 = vmul.f32 0.35355338, %v338_v52 }
 0x195   :  { %v276_v54 = vpop.f32.mrf.mxu0  ;;  %v363_v55 = vpop.xlane.xlu0 %362 }
 0x196   :  { %v346_v56 = vmul.f32 0.35355338, %v276_v54  ;;  %v358_v57 = vadd.f32 %v350_v53, %v88_v35  ;;  %v385_v58 = vsub.f32 %v352_v38, %v363_v55 }
 0x198   :  { %v379_v59 = vsel %vm360_vm2, %v358_v57, -inf  ;;  %v354_v60 = vadd.f32 %v346_v56, %v88_v35  ;;  %v393_v63 = vmul.f32 1.442695, %v385_v58 }
 0x199   :  { %380 = vmax.xlane.f32.xlu1 %v379_v59 }
 0x19a   :  { %v307_v61 = vpop.f32.mrf.mxu1  ;;  %v367_v62 = vsel %vm360_vm2, %v354_v60, -inf  ;;  %1894 = vpow2.f32 %v393_v63 }
 0x19b   :  { %v348_v0 = vmul.f32 0.35355338, %v307_v61  ;;  %v341_v1 = vpop.f32.mrf.mxu2  ;;  %368 = vmax.xlane.f32.xlu2 %v367_v62 }
 0x19c   :  { %v351_v2 = vmul.f32 0.35355338, %v341_v1 }
 0x19d   :  { %v279_v3 = vpop.f32.mrf.mxu0  ;;  %v366_v4 = vpop.xlane.xlu2 %365  ;;  %v356_v5 = vadd.f32 %v348_v0, %v88_v35 }
 0x19e   :  { %v347_v6 = vmul.f32 0.35355338, %v279_v3  ;;  %v359_v7 = vadd.f32 %v351_v2, %v89_v42  ;;  %v386_v10 = vsub.f32 %v353_v44, %v366_v4 }
 0x19f   :  { %v373_v11 = vsel %vm360_vm2, %v356_v5, -inf }
 0x1a0   :  { %v382_v12 = vsel %vm360_vm2, %v359_v7, -inf  ;;  %v355_v13 = vadd.f32 %v347_v6, %v89_v42  ;;  %v395_v16 = vmul.f32 1.442695, %v386_v10  ;;  %v2150_v18 = vpop.eup %1894 }
 0x1a1   :  { %374 = vmax.xlane.f32.xlu1 %v373_v11  ;;  %383 = vmax.xlane.f32.xlu0 %v382_v12  ;;  %v409_v21 = vsel %vm360_vm2, %v2150_v18, 0.0 }
 0x1a2   :  { %v310_v14 = vpop.f32.mrf.mxu1  ;;  %v370_v15 = vsel %vm360_vm2, %v355_v13, -inf  ;;  %1896 = vpow2.f32 %v395_v16 }
 0x1a3   :  { %v349_v17 = vmul.f32 0.35355338, %v310_v14  ;;  %371 = vmax.xlane.f32.xlu2 %v370_v15 }
 0x1a5   :  { %v357_v19 = vadd.f32 %v349_v17, %v89_v42 }
 0x1a7   :  { %v376_v20 = vsel %vm360_vm2, %v357_v19, -inf }
 0x1a8   :  { %v2155_v22 = vpop.eup %1896 }
 0x1a9   :  { %377 = vmax.xlane.f32.xlu0 %v376_v20  ;;  %410 = vadd.xlane.f32.xlu1 %v409_v21  ;;  %v412_v23 = vsel %vm360_vm2, %v2155_v22, 0.0  ;;  %v36_v20 = vld [vmem:[%s2674_s4 + $0x60] sm:$0xff] }
 0x1aa   :  { %690 = vmatpush.msra.mxu3 %v36_v20 }
 0x1b1   :  { %413 = vadd.xlane.f32.xlu0 %v412_v23 }
 0x20c   :  { %v381_v24 = vpop.xlane.xlu1 %380 }
 0x20d   :  { %v391_v25 = vsub.f32 %v358_v57, %v381_v24 }
 0x20e   :  { %v369_v26 = vpop.xlane.xlu2 %368 }
 0x20f   :  { %v405_v27 = vmul.f32 1.442695, %v391_v25  ;;  %v387_v28 = vsub.f32 %v354_v60, %v369_v26 }
 0x211   :  { %1898 = vpow2.f32 %v405_v27  ;;  %v397_v29 = vmul.f32 1.442695, %v387_v28 }
 0x213   :  { %1900 = vpow2.f32 %v397_v29 }
 0x214   :  { %v375_v30 = vpop.xlane.xlu1 %374  ;;  %v384_v31 = vpop.xlane.xlu0 %383 }
 0x215   :  { %v389_v32 = vsub.f32 %v356_v5, %v375_v30  ;;  %v392_v33 = vsub.f32 %v359_v7, %v384_v31 }
 0x216   :  { %v372_v34 = vpop.xlane.xlu2 %371 }
 0x217   :  { %v2159_v35 = vpop.eup %1898  ;;  %v401_v36 = vmul.f32 1.442695, %v389_v32  ;;  %v407_v37 = vmul.f32 1.442695, %v392_v33  ;;  %v388_v38 = vsub.f32 %v355_v13, %v372_v34 }
 0x218   :  { %v427_v39 = vsel %vm360_vm2, %v2159_v35, 0.0 }
 0x219   :  { %v2163_v40 = vpop.eup %1900  ;;  %1902 = vpow2.f32 %v401_v36  ;;  %v399_v41 = vmul.f32 1.442695, %v388_v38  ;;  %428 = vadd.xlane.f32.xlu2 %v427_v39 }
 0x21a   :  { %1904 = vpow2.f32 %v407_v37  ;;  %v415_v42 = vsel %vm360_vm2, %v2163_v40, 0.0 }
 0x21b   :  { %1906 = vpow2.f32 %v399_v41  ;;  %416 = vadd.xlane.f32.xlu1 %v415_v42 }
 0x21c   :  { %v411_v43 = vpop.xlane.xlu1 %410  ;;  %v378_v44 = vpop.xlane.xlu0 %377 }
 0x21d   :  { %1908 = vrcp.f32 %v411_v43  ;;  %v390_v45 = vsub.f32 %v357_v19, %v378_v44  ;;  %v444_v58 = vand.u32 2147483648, %v411_v43  ;;  %v442_v61 = vand.u32 2147483647, %v411_v43 }
 0x21e   :  { %vm438_vm4 = vweird.f32 %v411_v43 }
 0x21f   :  { %v2167_v46 = vpop.eup %1902  ;;  %v403_v48 = vmul.f32 1.442695, %v390_v45  ;;  %v445_v1 = vor.u32 1.1754944e-38, %v444_v58  ;;  %vm443_vm6 = vcmp.eq.f32.partialorder %v442_v61, 8.507059e+37 }
 0x220   :  { %v2169_v47 = vpop.eup %1904  ;;  %v421_v49 = vsel %vm360_vm2, %v2167_v46, 0.0 }
 0x221   :  { %v2173_v50 = vpop.eup %1906  ;;  %v430_v52 = vsel %vm360_vm2, %v2169_v47, 0.0  ;;  %422 = vadd.xlane.f32.xlu0 %v421_v49  ;;  %1910 = vpow2.f32 %v403_v48 }
 0x222   :  { %431 = vadd.xlane.f32.xlu2 %v430_v52  ;;  %v418_v53 = vsel %vm360_vm2, %v2173_v50, 0.0 }
 0x223   :  { %v1909_v54 = vpop.eup %1908  ;;  %419 = vadd.xlane.f32.xlu1 %v418_v53 }
 0x224   :  { %v434_v55 = vmul.f32 %v1909_v54, %v411_v43  ;;  %v414_v56 = vpop.xlane.xlu0 %413  ;;  %vm439_vm3 = vweird.f32 %v1909_v54 }
 0x225   :  { %1912 = vrcp.f32 %v414_v56  ;;  %vm440_vm5 = vmor %vm438_vm4, %vm439_vm3  ;;  %v459_v7 = vand.u32 2147483648, %v414_v56  ;;  %v457_v11 = vand.u32 2147483647, %v414_v56  ;;  %vm453_vm8 = vweird.f32 %v414_v56 }
 0x226   :  { %v435_v57 = vsub.f32 1.0, %v434_v55 }
 0x227   :  { %v2179_v59 = vpop.eup %1910  ;;  %v460_v13 = vor.u32 1.1754944e-38, %v459_v7  ;;  %vm458_vm10 = vcmp.eq.f32.partialorder %v457_v11, 8.507059e+37 }
 0x228   :  { %v436_v60 = vmul.f32 %v1909_v54, %v435_v57  ;;  %v424_v62 = vsel %vm360_vm2, %v2179_v59, 0.0 }
 0x229   :  { %425 = vadd.xlane.f32.xlu0 %v424_v62 }
 0x22a   :  { %v437_v63 = vadd.f32 %v1909_v54, %v436_v60 }
 0x22b   :  { %v1913_v0 = vpop.eup %1912 }
 0x22c   :  { %v449_v2 = vmul.f32 %v1913_v0, %v414_v56  ;;  %v441_v3 = vsel %vm440_vm5, %v1909_v54, %v437_v63  ;;  %vm454_vm7 = vweird.f32 %v1913_v0 }
 0x22d   :  { %v446_v4 = vsel %vm443_vm6, %v445_v1, %v441_v3  ;;  %vm455_vm9 = vmor %vm453_vm8, %vm454_vm7 }
 0x22e   :  { %v450_v5 = vsub.f32 1.0, %v449_v2  ;;  %v447_v6 = vmul.f32 %v2150_v18, %v446_v4 }
 0x230   :  { %v451_v10 = vmul.f32 %v1913_v0, %v450_v5  ;;  %1783 = vmatmul.msk.f32.vlgmr.msrb.gmra.mxu3 %vm360_vm2, %v447_v6 }
 0x232   :  { %v452_v12 = vadd.f32 %v1913_v0, %v451_v10 }
 0x234   :  { %v456_v14 = vsel %vm455_vm9, %v1913_v0, %v452_v12 }
 0x235   :  { %v461_v15 = vsel %vm458_vm10, %v460_v13, %v456_v14 }
 0x236   :  { %v462_v16 = vmul.f32 %v2155_v22, %v461_v15 }
 0x238   :  { %1784 = vmatmul.msk.f32.gmra.mxu3 %vm360_vm2, %v462_v16 }
 0x23a   :  { %1849 = vrot.lane.b32.xlu2 %v2143_v51, %s1998_s19 }
 0x23c   :  { %1854 = vrot.lane.b32.xlu1 %v2143_v51, %s1999_s0 }
 0x23d   :  { %1859 = vrot.lane.b32.xlu0 %v2143_v51, %s2000_s22 }
 0x28c   :  { %v429_v17 = vpop.xlane.xlu2 %428 }
 0x28d   :  { %1914 = vrcp.f32 %v429_v17  ;;  %v534_v28 = vand.u32 2147483648, %v429_v17  ;;  %vm528_vm12 = vweird.f32 %v429_v17  ;;  %v532_v30 = vand.u32 2147483647, %v429_v17 }
 0x28e   :  { %v2193_v18 = vpop.xlane.xlu1 %416 }
 0x28f   :  { %1916 = vrcp.f32 %v2193_v18  ;;  %v535_v38 = vor.u32 1.1754944e-38, %v534_v28  ;;  %vm533_vm14 = vcmp.eq.f32.partialorder %v532_v30, 8.507059e+37  ;;  %vm468_vm7 = vweird.f32 %v2193_v18 }
 0x290   :  { %v474_v3 = vand.u32 2147483648, %v2193_v18  ;;  %v472_v4 = vand.u32 2147483647, %v2193_v18 }
 0x292   :  { %v475_v14 = vor.u32 1.1754944e-38, %v474_v3 }
 0x293   :  { %v1915_v19 = vpop.eup %1914 }
 0x294   :  { %v524_v21 = vmul.f32 %v1915_v19, %v429_v17  ;;  %v2199_v22 = vpop.xlane.xlu0 %422  ;;  %vm529_vm11 = vweird.f32 %v1915_v19 }
 0x295   :  { %1918 = vrcp.f32 %v2199_v22  ;;  %v432_v23 = vpop.xlane.xlu2 %431  ;;  %v2204_v26 = vpop.eup %1916  ;;  %vm530_vm13 = vmor %vm528_vm12, %vm529_vm11  ;;  %v504_v7 = vand.u32 2147483648, %v2199_v22  ;;  %vm498_vm10 = vweird.f32 %v2199_v22  ;;  %v502_v12 = vand.u32 2147483647, %v2199_v22 }
 0x296   :  { %v525_v24 = vsub.f32 1.0, %v524_v21  ;;  %1920 = vrcp.f32 %v432_v23  ;;  %v2202_v25 = vpop.xlane.xlu1 %419  ;;  %v464_v32 = vmul.f32 %v2204_v26, %v2193_v18  ;;  %v549_v52 = vand.u32 2147483648, %v432_v23 }
 0x297   :  { %1922 = vrcp.f32 %v2202_v25  ;;  %vm543_vm3 = vweird.f32 %v432_v23  ;;  %v547_v56 = vand.u32 2147483647, %v432_v23  ;;  %vm469_vm6 = vweird.f32 %v2204_v26 }
 0x298   :  { %v526_v51 = vmul.f32 %v1915_v19, %v525_v24  ;;  %v465_v43 = vsub.f32 1.0, %v464_v32  ;;  %v550_v63 = vor.u32 1.1754944e-38, %v549_v52  ;;  %vm470_vm9 = vmor %vm468_vm7, %vm469_vm6  ;;  %vm473_vm12 = vcmp.eq.f32.partialorder %v472_v4, 8.507059e+37 }
 0x299   :  { %vm548_vm5 = vcmp.eq.f32.partialorder %v547_v56, 8.507059e+37 }
 0x29a   :  { %v527_v27 = vadd.f32 %v1915_v19, %v526_v51  ;;  %v466_v58 = vmul.f32 %v2204_v26, %v465_v43  ;;  %v37_v43 = vld [vmem:[%s2674_s4 + $0x68] sm:$0xff] }
 0x29b   :  { %v2206_v29 = vpop.eup %1918 }
 0x29c   :  { %v1921_v31 = vpop.eup %1920  ;;  %v531_v33 = vsel %vm530_vm13, %v1915_v19, %v527_v27  ;;  %v2211_v36 = vpop.xlane.xlu0 %425  ;;  %v494_v39 = vmul.f32 %v2206_v29, %v2199_v22  ;;  %v467_v0 = vadd.f32 %v2204_v26, %v466_v58  ;;  %vm499_vm8 = vweird.f32 %v2206_v29 }
 0x29d   :  { %v539_v34 = vmul.f32 %v1921_v31, %v432_v23  ;;  %v1850_v37 = vpop.permute.xlu2 %1849  ;;  %1924 = vrcp.f32 %v2211_v36  ;;  %v536_v42 = vsel %vm533_vm14, %v535_v38, %v531_v33  ;;  %v2216_v45 = vpop.eup %1922  ;;  %vm544_vm15 = vweird.f32 %v1921_v31  ;;  %vm500_vm11 = vmor %vm498_vm10, %vm499_vm8 }
 0x29e   :  { %v1851_v44 = vunpack.i.l.bf16 %v1850_v37  ;;  %v495_v49 = vsub.f32 1.0, %v494_v39  ;;  %v1852_v53 = vunpack.i.h.bf16 %v1850_v37  ;;  %v537_v54 = vmul.f32 %v2159_v35, %v536_v42  ;;  %vm545_vm4 = vmor %vm543_vm3, %vm544_vm15  ;;  %v39_v42 = vld [vmem:[%s2674_s4 + $0x78] sm:$0xff] }
 0x29f   :  { %v540_v41 = vsub.f32 1.0, %v539_v34  ;;  %v479_v60 = vmul.f32 %v2216_v45, %v2202_v25  ;;  %v471_v11 = vsel %vm470_vm9, %v2204_v26, %v467_v0  ;;  %vm503_vm13 = vcmp.eq.f32.partialorder %v502_v12, 8.507059e+37 }
 0x2a0   :  { %660 = vmatpush.msra.mxu2 %v1851_v44  ;;  %v496_v62 = vmul.f32 %v2206_v29, %v495_v49  ;;  %v476_v18 = vsel %vm473_vm12, %v475_v14, %v471_v11  ;;  %vm483_vm14 = vweird.f32 %v2202_v25  ;;  %vm484_vm15 = vweird.f32 %v2216_v45 }
 0x2a1   :  { %v541_v48 = vmul.f32 %v1921_v31, %v540_v41  ;;  %v480_v1 = vsub.f32 1.0, %v479_v60  ;;  %v489_v23 = vand.u32 2147483648, %v2202_v25  ;;  %v477_v26 = vmul.f32 %v2163_v40, %v476_v18 }
 0x2a2   :  { %661 = vmatpush.msra.mxu2 %v1852_v53  ;;  %v497_v5 = vadd.f32 %v2206_v29, %v496_v62  ;;  %v487_v27 = vand.u32 2147483647, %v2202_v25  ;;  %v517_v33 = vand.u32 2147483647, %v2211_v36 }
 0x2a3   :  { %v542_v55 = vadd.f32 %v1921_v31, %v541_v48  ;;  %v2219_v57 = vpop.eup %1924  ;;  %1789 = vmatmul.msk.f32.vlgmr.msra.gmra.mxu2 %vm360_vm2, %v537_v54  ;;  %v481_v13 = vmul.f32 %v2216_v45, %v480_v1  ;;  %v490_v34 = vor.u32 1.1754944e-38, %v489_v23 }
 0x2a4   :  { %v509_v35 = vmul.f32 %v2219_v57, %v2211_v36  ;;  %v501_v15 = vsel %vm500_vm11, %v2206_v29, %v497_v5  ;;  %vm514_vm3 = vweird.f32 %v2219_v57  ;;  %v519_v29 = vand.u32 2147483648, %v2211_v36  ;;  %777 = vmatpush.msrb.mxu2 %v39_v42  ;;  %v40_v42 = vld [vmem:[%s2674_s4 + $0x80] sm:$0xff] }
 0x2a5   :  { %v546_v61 = vsel %vm545_vm4, %v1921_v31, %v542_v55  ;;  %v482_v21 = vadd.f32 %v2216_v45, %v481_v13  ;;  %vm485_vm4 = vmor %vm483_vm14, %vm484_vm15  ;;  %vm488_vm7 = vcmp.eq.f32.partialorder %v487_v27, 8.507059e+37  ;;  %vm518_vm8 = vcmp.eq.f32.partialorder %v517_v33, 8.507059e+37 }
 0x2a6   :  { %v551_v2 = vsel %vm548_vm5, %v550_v63, %v546_v61  ;;  %v510_v6 = vsub.f32 1.0, %v509_v35  ;;  %vm513_vm5 = vweird.f32 %v2211_v36  ;;  %v520_v37 = vor.u32 1.1754944e-38, %v519_v29  ;;  %v1881_v63 = vld [vmem:[%s2674_s4 + $0x143] ss:$0 sm:$0xff] }
 0x2a7   :  { %v552_v10 = vmul.f32 %v2169_v47, %v551_v2  ;;  %v505_v47 = vor.u32 1.1754944e-38, %v504_v7  ;;  %v486_v32 = vsel %vm485_vm4, %v2216_v45, %v482_v21  ;;  %vm515_vm6 = vmor %vm513_vm5, %vm514_vm3 }
 0x2a8   :  { %v511_v16 = vmul.f32 %v2219_v57, %v510_v6  ;;  %v491_v38 = vsel %vm488_vm7, %v490_v34, %v486_v32 }
 0x2a9   :  { %v506_v22 = vsel %vm503_vm13, %v505_v47, %v501_v15 }
 0x2aa   :  { %v512_v28 = vadd.f32 %v2219_v57, %v511_v16  ;;  %v507_v40 = vmul.f32 %v2167_v46, %v506_v22  ;;  %v492_v46 = vmul.f32 %v2173_v50, %v491_v38  ;;  %v38_v50 = vld [vmem:[%s2674_s4 + $0x70] sm:$0xff] }
 0x2ab   :  { %1790 = vmatmul.msk.f32.gmra.mxu2 %vm360_vm2, %v552_v10  ;;  %v46_v22 = vld [vmem:[%s2674_s4 + $0xb0] sm:$0xff] }
 0x2ac   :  { %v516_v25 = vsel %vm515_vm6, %v2219_v57, %v512_v28 }
 0x2ad   :  { %v521_v39 = vsel %vm518_vm8, %v520_v37, %v516_v25 }
 0x2ae   :  { %v1855_v17 = vpop.permute.xlu1 %1854  ;;  %v522_v36 = vmul.f32 %v2179_v59, %v521_v39  ;;  %v2330_v39 = vld [vmem:[%s2671_s1 + $0x8] sm:$0xff] }
 0x2af   :  { %v1856_v19 = vunpack.i.l.bf16 %v1855_v17  ;;  %v1860_v20 = vpop.permute.xlu0 %1859  ;;  %v1857_v24 = vunpack.i.h.bf16 %v1855_v17 }
 0x2b0   :  { %v1861_v51 = vunpack.i.l.bf16 %v1860_v20  ;;  %v1862_v30 = vunpack.i.h.bf16 %v1860_v20 }
 0x2b1   :  { %602 = vmatpush.msra.mxu0 %v1856_v19  ;;  %v2001_v19 = vmov 32.0  }
 0x2b2   :  { %631 = vmatpush.msra.mxu1 %v1861_v51  ;;  %1926 = vrcp.f32 %v2001_v19  ;;  %v2317_v51 = vld [vmem:[%s2671_s1] sm:$0xff] }
 0x2b3   :  { %v576_v31 = vpop.f32.mrf.mxu3  ;;  %603 = vmatpush.msra.mxu0 %v1857_v24  ;;  %v44_v24 = vld [vmem:[%s2674_s4 + $0xa0] sm:$0xff] }
 0x2b4   :  { %1785 = vmatmul.msk.f32.vlgmr.msra.gmra.mxu0 %vm360_vm2, %v477_v26  ;;  %1791 = vmatmul.msk.f32.vlgmr.msra.gmra.mxu3 %vm219_vm1, %v576_v31 }
 0x2b5   :  { %632 = vmatpush.msra.mxu1 %v1862_v30  ;;  %719 = vmatpush.msrb.mxu0 %v37_v43 }
 0x2b6   :  { %1787 = vmatmul.msk.f32.vlgmr.msra.gmra.mxu1 %vm360_vm2, %v507_v40 }
 0x2b7   :  { %748 = vmatpush.msrb.mxu1 %v38_v50 }
 0x2b8   :  { %v1927_v20 = vpop.eup %1926 }
 0x2b9   :  { %v811_v21 = vmul.f32 32.0, %v1927_v20  ;;  %vm815_vm9 = vweird.f32 %v1927_v20 }
 0x2bb   :  { %v579_v41 = vpop.f32.mrf.mxu3  ;;  %v812_v23 = vsub.f32 1.0, %v811_v21 }
 0x2bc   :  { %1786 = vmatmul.msk.f32.gmra.mxu0 %vm360_vm2, %v492_v46  ;;  %1792 = vmatmul.msk.f32.gmra.mxu3 %vm219_vm1, %v579_v41  ;;  %v43_v46 = vld [vmem:[%s2674_s4 + $0x98] sm:$0xff]  ;;  %v42_v41 = vld [vmem:[%s2674_s4 + $0x90] sm:$0xff] }
 0x2bd   :  { %v813_v26 = vmul.f32 %v1927_v20, %v812_v23  ;;  %880 = vmatpush.msrb.mxu3 %v43_v46  ;;  %v49_v23 = vld [vmem:[%s2674_s4 + $0xc8] sm:$0xff] }
 0x2be   :  { %1788 = vmatmul.msk.f32.gmra.mxu1 %vm360_vm2, %v522_v36  ;;  %v41_v36 = vld [vmem:[%s2674_s4 + $0x88] sm:$0xff] }
 0x2bf   :  { %v814_v27 = vadd.f32 %v1927_v20, %v813_v26  ;;  %881 = vmatpush.msrb.mxu3 %v42_v41 }
 0x2c1   :  { %v2321_v28 = vsel %vm815_vm9, %v1927_v20, %v814_v27  ;;  %882 = vmatpush.msrb.mxu3 %v41_v36 }
 0x2c3   :  { %883 = vmatpush.msrb.mxu3 %v40_v42 }
 0x326   :  { %v663_v44 = vpop.f32.mrf.mxu2 }
 0x327   :  { %1797 = vmatmul.msk.f32.vlgmr.msrb.gmra.mxu2 %vm219_vm1, %v663_v44 }
 0x32e   :  { %v666_v59 = vpop.f32.mrf.mxu2 }
 0x32f   :  { %1798 = vmatmul.msk.f32.gmra.mxu2 %vm219_vm1, %v666_v59  ;;  %v1884_v59 = vld [vmem:[%s2674_s4 + $0x145] ss:$0 sm:$0xff] }
 0x331   :  { %v605_v45 = vpop.f32.mrf.mxu0 }
 0x332   :  { %1793 = vmatmul.msk.f32.vlgmr.msrb.gmra.mxu0 %vm219_vm1, %v605_v45 }
 0x333   :  { %v634_v48 = vpop.f32.mrf.mxu1 }
 0x334   :  { %1795 = vmatmul.msk.f32.vlgmr.msrb.gmra.mxu1 %vm219_vm1, %v634_v48 }
 0x337   :  { %v692_v53 = vpop.f32.mrf.mxu3 }
 0x338   :  { %v785_v56 = vsel %vm93_vm0, %v692_v53, 0.0 }
 0x339   :  { %v608_v49 = vpop.f32.mrf.mxu0 }
 0x33a   :  { %1794 = vmatmul.msk.f32.gmra.mxu0 %vm219_vm1, %v608_v49 }
 0x33b   :  { %v637_v52 = vpop.f32.mrf.mxu1 }
 0x33c   :  { %1796 = vmatmul.msk.f32.gmra.mxu1 %vm219_vm1, %v637_v52 }
 0x33f   :  { %v695_v0 = vpop.f32.mrf.mxu3 }
 0x340   :  { %v792_v4 = vsel %vm93_vm0, %v695_v0, 0.0 }
 0x3aa   :  { %v779_v54 = vpop.f32.mrf.mxu2 }
 0x3ab   :  { %v790_v35 = vsel %vm93_vm0, %v779_v54, 0.0 }
 0x3af   :  { %v721_v55 = vpop.f32.mrf.mxu0 }
 0x3b0   :  { %v786_v57 = vsel %vm93_vm0, %v721_v55, 0.0 }
 0x3b1   :  { %v787_v58 = vadd.f32 %v786_v57, %v785_v56  ;;  %v750_v60 = vpop.f32.mrf.mxu1 }
 0x3b2   :  { %v788_v61 = vsel %vm93_vm0, %v750_v60, 0.0  ;;  %v782_v6 = vpop.f32.mrf.mxu2 }
 0x3b3   :  { %v789_v62 = vadd.f32 %v788_v61, %v787_v58  ;;  %v797_v15 = vsel %vm93_vm0, %v782_v6, 0.0 }
 0x3b5   :  { %v791_v1 = vadd.f32 %v790_v35, %v789_v62 }
 0x3b7   :  { %v724_v2 = vpop.f32.mrf.mxu0  ;;  %v800_v3 = vadd.f32 %v1881_v63, %v791_v1 }
 0x3b8   :  { %v793_v5 = vsel %vm93_vm0, %v724_v2, 0.0  ;;  %v1883_v2 = vld [vmem:[%s2674_s4 + $0x14a] ss:$0 sm:$0xff] }
 0x3b9   :  { %v794_v7 = vadd.f32 %v793_v5, %v792_v4  ;;  %v753_v10 = vpop.f32.mrf.mxu1  ;;  %v802_v11 = vadd.f32 %v800_v3, %v2067_v8  ;;  %v47_v8 = vld [vmem:[%s2674_s4 + $0xb8] sm:$0xff] }
 0x3ba   :  { %v795_v12 = vsel %vm93_vm0, %v753_v10, 0.0  ;;  %910 = vmatpush.msra.mxu0 %v47_v8  ;;  %v51_v8 = vld [vmem:[%s2674_s4 + $0xd8] sm:$0xff] }
 0x3bb   :  { %v796_v13 = vadd.f32 %v795_v12, %v794_v7  ;;  %v804_v14 = vsel %vm93_vm0, %v802_v11, 0.0  ;;  %934 = vmatpush.msra.mxu1 %v51_v8 }
 0x3bc   :  { %805 = vadd.xlane.f32.xlu2 %v804_v14  ;;  %911 = vmatpush.msra.mxu0 %v46_v22  ;;  %v50_v22 = vld [vmem:[%s2674_s4 + $0xd0] sm:$0xff] }
 0x3bd   :  { %v798_v16 = vadd.f32 %v797_v15, %v796_v13  ;;  %935 = vmatpush.msra.mxu1 %v50_v22 }
 0x3bf   :  { %v801_v17 = vadd.f32 %v1881_v63, %v798_v16  ;;  %v1882_v63 = vld [vmem:[%s2674_s4 + $0x149] ss:$0 sm:$0xff]  ;;  %v1885_v16 = vld [vmem:[%s2674_s4 + $0x144] ss:$0 sm:$0xff]  ;;  %936 = vmatpush.msra.mxu1 %v49_v23 }
 0x3c1   :  { %v803_v18 = vadd.f32 %v801_v17, %v2076_v9  ;;  %v45_v9 = vld [vmem:[%s2674_s4 + $0xa8] sm:$0xff] }
 0x3c2   :  { %912 = vmatpush.msra.mxu0 %v45_v9  ;;  %v48_v9 = vld [vmem:[%s2674_s4 + $0xc0] sm:$0xff] }
 0x3c3   :  { %v807_v47 = vsel %vm93_vm0, %v803_v18, 0.0  ;;  %937 = vmatpush.msra.mxu1 %v48_v9 }
 0x3c4   :  { %808 = vadd.xlane.f32.xlu1 %v807_v47  ;;  %913 = vmatpush.msra.mxu0 %v44_v24 }
 0x3c5   :  { %1801 = vmatmul.msk.f32.vlgmr.msra.gmra.mxu0 %vm93_vm0, %v2317_v51  ;;  %1803 = vmatmul.msk.f32.vlgmr.msra.gmra.mxu1 %vm93_vm0, %v2317_v51  ;;  %v90_v51 = vld [vmem:[%s2673_s3] sm:$0xff] }
 0x3cd   :  { %1802 = vmatmul.msk.f32.gmra.mxu0 %vm93_vm0, %v2330_v39  ;;  %1804 = vmatmul.msk.f32.gmra.mxu1 %vm93_vm0, %v2330_v39  ;;  %v91_v39 = vld [vmem:[%s2673_s3 + $0x8] sm:$0xff] }
 0x42f   :  { %v806_v29 = vpop.xlane.xlu2 %805 }
 0x430   :  { %v817_v30 = vmul.f32 %v2321_v28, %v806_v29 }
 0x432   :  { %v819_v31 = vsub.f32 %v802_v11, %v817_v30 }
 0x434   :  { %v821_v40 = vmul.f32 %v819_v31, %v819_v31 }
 0x436   :  { %v823_v32 = vsel %vm93_vm0, %v821_v40, 0.0 }
 0x437   :  { %824 = vadd.xlane.f32.xlu0 %v823_v32  ;;  %v809_v33 = vpop.xlane.xlu1 %808 }
 0x438   :  { %v818_v34 = vmul.f32 %v2321_v28, %v809_v33 }
 0x43a   :  { %v820_v25 = vsub.f32 %v803_v18, %v818_v34 }
 0x43c   :  { %v822_v37 = vmul.f32 %v820_v25, %v820_v25 }
 0x43e   :  { %v826_v38 = vsel %vm93_vm0, %v822_v37, 0.0 }
 0x43f   :  { %827 = vadd.xlane.f32.xlu2 %v826_v38 }
 0x442   :  { %v915_v45 = vpop.f32.mrf.mxu0 }
 0x443   :  { %v916_v48 = vadd.f32 %v1884_v59, %v915_v45 }
 0x44a   :  { %v918_v14 = vpop.f32.mrf.mxu0 }
 0x44b   :  { %961 = vrot.lane.b32.xlu0 %v916_v48, %s1999_s0  ;;  %v919_v15 = vadd.f32 %v1884_v59, %v918_v14 }
 0x44d   :  { %963 = vrot.lane.b32.xlu1 %v919_v15, %s1999_s0  ;;  %1805 = vmatpush.xpose.msk.msra.mxu2 %vm219_vm1, %v919_v15 }
 0x451   :  { %1806 = vmatpush.xpose.msk.msra.mxu2 %vm219_vm1, %v916_v48 }
 0x455   :  { %967 = vrot.lane.b32.xlu1 %v919_v15, %s2000_s22 }
 0x45d   :  { %969 = vrot.lane.b32.xlu1 %v916_v48, %s1998_s19 }
 0x4aa   :  { %v825_v43 = vpop.xlane.xlu0 %824 }
 0x4ab   :  { %v829_v50 = vmul.f32 %v825_v43, %v2321_v28 }
 0x4ad   :  { %v831_v44 = vadd.f32 1e-05, %v829_v50  ;;  %v939_v50 = vpop.f32.mrf.mxu1 }
 0x4af   :  { %1928 = vrsqrt.f32 %v831_v44  ;;  %vm839_vm11 = vweird.f32 %v831_v44 }
 0x4b2   :  { %v828_v49 = vpop.xlane.xlu2 %827 }
 0x4b3   :  { %v830_v52 = vmul.f32 %v828_v49, %v2321_v28 }
 0x4b5   :  { %v1929_v53 = vpop.eup %1928  ;;  %v832_v54 = vadd.f32 1e-05, %v830_v52  ;;  %v942_v59 = vpop.f32.mrf.mxu1 }
 0x4b6   :  { %v834_v55 = vmul.f32 %v1929_v53, %v831_v44  ;;  %vm840_vm10 = vweird.f32 %v1929_v53  ;;  %v1886_v44 = vld [vmem:[%s2674_s4 + $0x146] ss:$0 sm:$0xff] }
 0x4b7   :  { %1930 = vrsqrt.f32 %v832_v54  ;;  %vm841_vm12 = vmor %vm839_vm11, %vm840_vm10  ;;  %vm849_vm14 = vweird.f32 %v832_v54  ;;  %v940_v45 = vadd.f32 %v1886_v44, %v939_v50 }
 0x4b8   :  { %v835_v56 = vmul.f32 %v1929_v53, %v834_v55 }
 0x4ba   :  { %v836_v57 = vmul.f32 0.5, %v835_v56 }
 0x4bc   :  { %v837_v58 = vsub.f32 1.5, %v836_v57 }
 0x4bd   :  { %v1931_v60 = vpop.eup %1930  ;;  %v962_v21 = vpop.permute.xlu0 %961 }
 0x4be   :  { %v838_v61 = vmul.f32 %v1929_v53, %v837_v58  ;;  %v844_v62 = vmul.f32 %v1931_v60, %v832_v54  ;;  %vm850_vm13 = vweird.f32 %v1931_v60 }
 0x4bf   :  { %vm851_vm15 = vmor %vm849_vm14, %vm850_vm13  ;;  %v964_v20 = vpop.permute.xlu1 %963 }
 0x4c0   :  { %v842_v35 = vsel %vm841_vm12, %v1929_v53, %v838_v61  ;;  %v845_v0 = vmul.f32 %v1931_v60, %v844_v62  ;;  %1809 = vmatpush.xpose.msk.msra.mxu3 %vm219_vm1, %v964_v20 }
 0x4c1   :  { %v853_v1 = vmul.f32 %v842_v35, %v819_v31 }
 0x4c2   :  { %v846_v3 = vmul.f32 0.5, %v845_v0 }
 0x4c3   :  { %v856_v4 = vmul.f32 %v1882_v63, %v853_v1 }
 0x4c4   :  { %v847_v5 = vsub.f32 1.5, %v846_v3  ;;  %1810 = vmatpush.xpose.msk.msra.mxu3 %vm219_vm1, %v962_v21 }
 0x4c5   :  { %v2358_v6 = vadd.f32 %v1883_v2, %v856_v4 }
 0x4c6   :  { %v848_v7 = vmul.f32 %v1931_v60, %v847_v5 }
 0x4c7   :  { %1799 = vmatmul.msk.f32.vlgmr.msrb.gmra.mxu3 %vm93_vm0, %v2358_v6  ;;  %v968_v24 = vpop.permute.xlu1 %967 }
 0x4c8   :  { %v852_v10 = vsel %vm851_vm15, %v1931_v60, %v848_v7  ;;  %1813 = vmatpush.xpose.msk.msrb.mxu0 %vm219_vm1, %v968_v24 }
 0x4c9   :  { %v854_v11 = vmul.f32 %v852_v10, %v820_v25 }
 0x4cb   :  { %v857_v12 = vmul.f32 %v1882_v63, %v854_v11 }
 0x4cd   :  { %v2362_v13 = vadd.f32 %v1883_v2, %v857_v12 }
 0x4cf   :  { %1800 = vmatmul.msk.f32.gmra.mxu3 %vm93_vm0, %v2362_v13  ;;  %v970_v29 = vpop.permute.xlu1 %969 }
 0x54a   :  { %v885_v17 = vpop.f32.mrf.mxu3 }
 0x54b   :  { %v886_v18 = vadd.f32 %v1885_v16, %v885_v17 }
 0x54d   :  { %1807 = vmatmul.msk.f32.vlgmr.msra.gmra.mxu2 %vm219_vm1, %v886_v18  ;;  %947 = vrot.lane.b32.xlu2 %v886_v18, %s1999_s0 }
 0x552   :  { %v888_v47 = vpop.f32.mrf.mxu3 }
 0x553   :  { %v889_v19 = vadd.f32 %v1885_v16, %v888_v47 }
 0x555   :  { %971 = vrot.lane.b32.xlu2 %v919_v15, %s1998_s19  ;;  %953 = vrot.lane.b32.xlu1 %v889_v19, %s2000_s22 }
 0x556   :  { %949 = vrot.lane.b32.xlu0 %v889_v19, %s1999_s0  ;;  %1808 = vmatmul.msk.f32.gmra.mxu2 %vm219_vm1, %v889_v19 }
 0x55d   :  { %951 = vrot.lane.b32.xlu2 %v886_v18, %s2000_s22 }
 0x55e   :  { %965 = vrot.lane.b32.xlu0 %v916_v48, %s2000_s22  ;;  %v943_v48 = vadd.f32 %v1886_v44, %v942_v59 }
 0x560   :  { %1345 = vmatpush.msrb.mxu2 %v943_v48  ;;  %v2423_v54 = vpack.i.bf16 %v940_v45, %v943_v48 }
 0x562   :  { %1346 = vmatpush.msrb.mxu2 %v940_v45 }
 0x565   :  { %957 = vrot.lane.b32.xlu2 %v889_v19, %s1998_s19 }
 0x566   :  { %955 = vrot.lane.b32.xlu0 %v886_v18, %s1998_s19 }
 0x5a7   :  { %v948_v26 = vpop.permute.xlu2 %947 }
 0x5a8   :  { %1811 = vmatmul.msk.f32.vlgmr.msra.gmra.mxu3 %vm219_vm1, %v948_v26 }
 0x5af   :  { %v972_v27 = vpop.permute.xlu2 %971 }
 0x5b0   :  { %1817 = vmatpush.xpose.msk.msrb.mxu1 %vm219_vm1, %v972_v27 }
 0x5b4   :  { %1818 = vmatpush.xpose.msk.msrb.mxu1 %vm219_vm1, %v970_v29 }
 0x5b7   :  { %v952_v33 = vpop.permute.xlu2 %951 }
 0x5bf   :  { %v958_v43 = vpop.permute.xlu2 %957 }
 0x5c7   :  { %v954_v41 = vpop.permute.xlu1 %953 }
 0x5c8   :  { %v950_v30 = vpop.permute.xlu0 %949 }
 0x5c9   :  { %1812 = vmatmul.msk.f32.gmra.mxu3 %vm219_vm1, %v950_v30 }
 0x5d0   :  { %v966_v31 = vpop.permute.xlu0 %965  ;;  %v1018_v40 = vpop.f32.mrf.mxu2 }
 0x5d1   :  { %v1117_v32 = vmul.f32 0.35355338, %v1018_v40  ;;  %1814 = vmatpush.xpose.msk.msrb.mxu0 %vm219_vm1, %v966_v31 }
 0x5d3   :  { %v1125_v34 = vadd.f32 %v1117_v32, %v90_v51 }
 0x5d4   :  { %1815 = vmatmul.msk.f32.vlgmr.msrb.gmra.mxu0 %vm219_vm1, %v952_v33 }
 0x5d5   :  { %v1133_v25 = vsel %vm360_vm2, %v1125_v34, -inf }
 0x5d6   :  { %1134 = vmax.xlane.f32.xlu0 %v1133_v25 }
 0x5d8   :  { %v956_v37 = vpop.permute.xlu0 %955 }
 0x5d9   :  { %v1021_v38 = vpop.f32.mrf.mxu2  ;;  %1819 = vmatmul.msk.f32.vlgmr.msrb.gmra.mxu1 %vm219_vm1, %v956_v37 }
 0x5da   :  { %v1118_v46 = vmul.f32 0.35355338, %v1021_v38 }
 0x5dc   :  { %1816 = vmatmul.msk.f32.gmra.mxu0 %vm219_vm1, %v954_v41  ;;  %v1126_v36 = vadd.f32 %v1118_v46, %v91_v39 }
 0x5de   :  { %v1136_v42 = vsel %vm360_vm2, %v1126_v36, -inf }
 0x5df   :  { %1137 = vmax.xlane.f32.xlu2 %v1136_v42 }
 0x5e1   :  { %1820 = vmatmul.msk.f32.gmra.mxu1 %vm219_vm1, %v958_v43 }
 0x62b   :  { %v1049_v49 = vpop.f32.mrf.mxu3 }
 0x62c   :  { %v1119_v52 = vmul.f32 0.35355338, %v1049_v49 }
 0x62e   :  { %v1127_v53 = vadd.f32 %v1119_v52, %v90_v51 }
 0x630   :  { %v1139_v55 = vsel %vm360_vm2, %v1127_v53, -inf }
 0x631   :  { %1140 = vmax.xlane.f32.xlu1 %v1139_v55 }
 0x649   :  { %v1135_v58 = vpop.xlane.xlu0 %1134 }
 0x64a   :  { %v1157_v63 = vsub.f32 %v1125_v34, %v1135_v58 }
 0x64c   :  { %v1052_v56 = vpop.f32.mrf.mxu3  ;;  %v1165_v1 = vmul.f32 1.442695, %v1157_v63 }
 0x64d   :  { %v1120_v57 = vmul.f32 0.35355338, %v1052_v56 }
 0x64e   :  { %1932 = vpow2.f32 %v1165_v1 }
 0x64f   :  { %v1128_v60 = vadd.f32 %v1120_v57, %v91_v39 }
 0x651   :  { %v1080_v61 = vpop.f32.mrf.mxu0  ;;  %v1142_v62 = vsel %vm360_vm2, %v1128_v60, -inf }
 0x652   :  { %v1121_v35 = vmul.f32 0.35355338, %v1080_v61  ;;  %1143 = vmax.xlane.f32.xlu0 %v1142_v62  ;;  %v1138_v4 = vpop.xlane.xlu2 %1137 }
 0x653   :  { %v1158_v11 = vsub.f32 %v1126_v36, %v1138_v4 }
 0x654   :  { %v1129_v0 = vadd.f32 %v1121_v35, %v90_v51  ;;  %v2430_v19 = vpop.eup %1932 }
 0x655   :  { %v1167_v16 = vmul.f32 1.442695, %v1158_v11  ;;  %v1181_v21 = vsel %vm360_vm2, %v2430_v19, 0.0 }
 0x656   :  { %v1111_v2 = vpop.f32.mrf.mxu1  ;;  %v1145_v3 = vsel %vm360_vm2, %v1129_v0, -inf }
 0x657   :  { %v1123_v5 = vmul.f32 0.35355338, %v1111_v2  ;;  %1146 = vmax.xlane.f32.xlu1 %v1145_v3  ;;  %1934 = vpow2.f32 %v1167_v16 }
 0x659   :  { %v1083_v7 = vpop.f32.mrf.mxu0  ;;  %v1131_v10 = vadd.f32 %v1123_v5, %v90_v51 }
 0x65a   :  { %v1122_v12 = vmul.f32 0.35355338, %v1083_v7 }
 0x65b   :  { %v1151_v14 = vsel %vm360_vm2, %v1131_v10, -inf }
 0x65c   :  { %1152 = vmax.xlane.f32.xlu2 %v1151_v14  ;;  %v1130_v15 = vadd.f32 %v1122_v12, %v91_v39 }
 0x65d   :  { %v2435_v22 = vpop.eup %1934 }
 0x65e   :  { %v1114_v17 = vpop.f32.mrf.mxu1  ;;  %v1148_v18 = vsel %vm360_vm2, %v1130_v15, -inf  ;;  %v1184_v23 = vsel %vm360_vm2, %v2435_v22, 0.0 }
 0x65f   :  { %v1124_v47 = vmul.f32 0.35355338, %v1114_v17  ;;  %1149 = vmax.xlane.f32.xlu0 %v1148_v18 }
 0x661   :  { %v1132_v20 = vadd.f32 %v1124_v47, %v91_v39 }
 0x663   :  { %v1154_v8 = vsel %vm360_vm2, %v1132_v20, -inf }
 0x664   :  { %1182 = vadd.xlane.f32.xlu2 %v1181_v21  ;;  %1155 = vmax.xlane.f32.xlu1 %v1154_v8 }
 0x66c   :  { %1185 = vadd.xlane.f32.xlu1 %v1184_v23 }
 0x6a4   :  { %v1141_v9 = vpop.xlane.xlu1 %1140 }
 0x6a5   :  { %v1159_v31 = vsub.f32 %v1127_v53, %v1141_v9 }
 0x6a7   :  { %v1169_v34 = vmul.f32 1.442695, %v1159_v31 }
 0x6c5   :  { %v1144_v24 = vpop.xlane.xlu0 %1143 }
 0x6c6   :  { %v1160_v26 = vsub.f32 %v1128_v60, %v1144_v24 }
 0x6c8   :  { %v1171_v27 = vmul.f32 1.442695, %v1160_v26 }
 0x6ca   :  { %1936 = vpow2.f32 %v1171_v27  ;;  %v1147_v29 = vpop.xlane.xlu1 %1146 }
 0x6cb   :  { %v1161_v30 = vsub.f32 %v1129_v0, %v1147_v29 }
 0x6cd   :  { %v1173_v40 = vmul.f32 1.442695, %v1161_v30 }
 0x6cf   :  { %1938 = vpow2.f32 %v1173_v40  ;;  %v1153_v51 = vpop.xlane.xlu2 %1152 }
 0x6d0   :  { %v2439_v32 = vpop.eup %1936  ;;  %v1163_v33 = vsub.f32 %v1131_v10, %v1153_v51 }
 0x6d1   :  { %v1190_v25 = vsel %vm360_vm2, %v2439_v32, 0.0 }
 0x6d2   :  { %v1177_v37 = vmul.f32 1.442695, %v1163_v33  ;;  %1191 = vadd.xlane.f32.xlu2 %v1190_v25  ;;  %v1150_v38 = vpop.xlane.xlu0 %1149 }
 0x6d3   :  { %v1162_v39 = vsub.f32 %v1130_v15, %v1150_v38 }
 0x6d4   :  { %1940 = vpow2.f32 %v1177_v37 }
 0x6d5   :  { %v2443_v46 = vpop.eup %1938  ;;  %1942 = vpow2.f32 %v1169_v34  ;;  %v1175_v43 = vmul.f32 1.442695, %v1162_v39 }
 0x6d6   :  { %v1193_v41 = vsel %vm360_vm2, %v2443_v46, 0.0 }
 0x6d7   :  { %v1183_v36 = vpop.xlane.xlu2 %1182  ;;  %1194 = vadd.xlane.f32.xlu0 %v1193_v41  ;;  %v1156_v42 = vpop.xlane.xlu1 %1155 }
 0x6d8   :  { %1944 = vrcp.f32 %v1183_v36  ;;  %v1164_v50 = vsub.f32 %v1132_v20, %v1156_v42  ;;  %v1216_v58 = vand.u32 2147483648, %v1183_v36  ;;  %v1214_v62 = vand.u32 2147483647, %v1183_v36  ;;  %v53_v42 = vld [vmem:[%s2674_s4 + $0xe8] sm:$0xff] }
 0x6d9   :  { %1946 = vpow2.f32 %v1175_v43  ;;  %vm1210_vm4 = vweird.f32 %v1183_v36 }
 0x6da   :  { %v2447_v44 = vpop.eup %1940  ;;  %v1179_v45 = vmul.f32 1.442695, %v1164_v50  ;;  %v1217_v1 = vor.u32 1.1754944e-38, %v1216_v58  ;;  %vm1215_vm6 = vcmp.eq.f32.partialorder %v1214_v62, 8.507059e+37 }
 0x6db   :  { %v2449_v59 = vpop.eup %1942  ;;  %v1199_v48 = vsel %vm360_vm2, %v2447_v44, 0.0 }
 0x6dc   :  { %1200 = vadd.xlane.f32.xlu1 %v1199_v48  ;;  %1948 = vpow2.f32 %v1179_v45  ;;  %v1187_v52 = vsel %vm360_vm2, %v2449_v59, 0.0 }
 0x6de   :  { %v1945_v49 = vpop.eup %1944 }
 0x6df   :  { %v1206_v53 = vmul.f32 %v1945_v49, %v1183_v36  ;;  %1188 = vadd.xlane.f32.xlu0 %v1187_v52  ;;  %v1186_v55 = vpop.xlane.xlu1 %1185  ;;  %v2455_v57 = vpop.eup %1946  ;;  %vm1211_vm3 = vweird.f32 %v1945_v49 }
 0x6e0   :  { %1950 = vrcp.f32 %v1186_v55  ;;  %vm1212_vm5 = vmor %vm1210_vm4, %vm1211_vm3  ;;  %v1196_v2 = vsel %vm360_vm2, %v2455_v57, 0.0  ;;  %v1231_v11 = vand.u32 2147483648, %v1186_v55  ;;  %v1229_v14 = vand.u32 2147483647, %v1186_v55 }
 0x6e1   :  { %v1207_v56 = vsub.f32 1.0, %v1206_v53  ;;  %vm1225_vm8 = vweird.f32 %v1186_v55 }
 0x6e2   :  { %v2457_v60 = vpop.eup %1948  ;;  %v1232_v16 = vor.u32 1.1754944e-38, %v1231_v11  ;;  %vm1230_vm10 = vcmp.eq.f32.partialorder %v1229_v14, 8.507059e+37 }
 0x6e3   :  { %v1208_v61 = vmul.f32 %v1945_v49, %v1207_v56  ;;  %v1202_v63 = vsel %vm360_vm2, %v2457_v60, 0.0 }
 0x6e4   :  { %1203 = vadd.xlane.f32.xlu1 %v1202_v63 }
 0x6e5   :  { %v1209_v35 = vadd.f32 %v1945_v49, %v1208_v61 }
 0x6e6   :  { %v1951_v0 = vpop.eup %1950 }
 0x6e7   :  { %v1213_v3 = vsel %vm1212_vm5, %v1945_v49, %v1209_v35  ;;  %v1221_v4 = vmul.f32 %v1951_v0, %v1186_v55  ;;  %1197 = vadd.xlane.f32.xlu0 %v1196_v2  ;;  %vm1226_vm7 = vweird.f32 %v1951_v0 }
 0x6e8   :  { %v1218_v5 = vsel %vm1215_vm6, %v1217_v1, %v1213_v3  ;;  %vm1227_vm9 = vmor %vm1225_vm8, %vm1226_vm7 }
 0x6e9   :  { %v1222_v7 = vsub.f32 1.0, %v1221_v4  ;;  %v1219_v10 = vmul.f32 %v2430_v19, %v1218_v5 }
 0x6ea   :  { %1864 = vrot.lane.b32.xlu2 %v2423_v54, %s1999_s0 }
 0x6eb   :  { %v1223_v12 = vmul.f32 %v1951_v0, %v1222_v7  ;;  %1821 = vmatmul.msk.f32.vlgmr.msrb.gmra.mxu2 %vm360_vm2, %v1219_v10 }
 0x6ed   :  { %v1224_v15 = vadd.f32 %v1951_v0, %v1223_v12 }
 0x6ef   :  { %v1228_v17 = vsel %vm1227_vm9, %v1951_v0, %v1224_v15 }
 0x6f0   :  { %v1233_v18 = vsel %vm1230_vm10, %v1232_v16, %v1228_v17 }
 0x6f1   :  { %v1234_v47 = vmul.f32 %v2435_v22, %v1233_v18  ;;  %v52_v22 = vld [vmem:[%s2674_s4 + $0xe0] sm:$0xff] }
 0x6f2   :  { %1462 = vmatpush.msra.mxu2 %v52_v22 }
 0x6f3   :  { %1822 = vmatmul.msk.f32.gmra.mxu2 %vm360_vm2, %v1234_v47 }
 0x6fb   :  { %1869 = vrot.lane.b32.xlu0 %v2423_v54, %s2000_s22 }
 0x6fd   :  { %1874 = vrot.lane.b32.xlu1 %v2423_v54, %s1998_s19 }
 0x745   :  { %v2473_v19 = vpop.xlane.xlu2 %1191 }
 0x746   :  { %1952 = vrcp.f32 %v2473_v19  ;;  %v1261_v56 = vand.u32 2147483648, %v2473_v19  ;;  %vm1255_vm3 = vweird.f32 %v2473_v19  ;;  %v1259_v35 = vand.u32 2147483647, %v2473_v19 }
 0x748   :  { %v1262_v3 = vor.u32 1.1754944e-38, %v1261_v56  ;;  %vm1260_vm6 = vcmp.eq.f32.partialorder %v1259_v35, 8.507059e+37 }
 0x74a   :  { %v2475_v20 = vpop.xlane.xlu0 %1194 }
 0x74b   :  { %1954 = vrcp.f32 %v2475_v20  ;;  %v1276_v7 = vand.u32 2147483648, %v2475_v20  ;;  %vm1270_vm7 = vweird.f32 %v2475_v20 }
 0x74c   :  { %v1953_v24 = vpop.eup %1952 }
 0x74d   :  { %v1865_v21 = vpop.permute.xlu2 %1864  ;;  %v1251_v26 = vmul.f32 %v1953_v24, %v2473_v19  ;;  %vm1256_vm14 = vweird.f32 %v1953_v24  ;;  %v1277_v17 = vor.u32 1.1754944e-38, %v1276_v7 }
 0x74e   :  { %v1866_v8 = vunpack.i.l.bf16 %v1865_v21  ;;  %v1867_v23 = vunpack.i.h.bf16 %v1865_v21  ;;  %vm1257_vm4 = vmor %vm1255_vm3, %vm1256_vm14 }
 0x74f   :  { %v2481_v9 = vpop.xlane.xlu1 %1200  ;;  %v1252_v30 = vsub.f32 1.0, %v1251_v26 }
 0x750   :  { %1374 = vmatpush.msrb.mxu3 %v1866_v8  ;;  %v1306_v15 = vand.u32 2147483648, %v2481_v9  ;;  %vm1300_vm10 = vweird.f32 %v2481_v9  ;;  %v1304_v18 = vand.u32 2147483647, %v2481_v9 }
 0x751   :  { %v2486_v27 = vpop.eup %1954  ;;  %v1253_v37 = vmul.f32 %v1953_v24, %v1252_v30 }
 0x752   :  { %1375 = vmatpush.msrb.mxu3 %v1867_v23  ;;  %v1189_v54 = vpop.xlane.xlu0 %1188  ;;  %v1266_v34 = vmul.f32 %v2486_v27, %v2475_v20  ;;  %vm1271_vm5 = vweird.f32 %v2486_v27  ;;  %vm1305_vm14 = vcmp.eq.f32.partialorder %v1304_v18, 8.507059e+37 }
 0x753   :  { %1956 = vrcp.f32 %v1189_v54  ;;  %v1246_v38 = vand.u32 2147483648, %v1189_v54  ;;  %v1244_v36 = vand.u32 2147483647, %v1189_v54  ;;  %vm1240_vm12 = vweird.f32 %v1189_v54  ;;  %vm1272_vm8 = vmor %vm1270_vm7, %vm1271_vm5 }
 0x754   :  { %1958 = vrcp.f32 %v2481_v9  ;;  %v1267_v43 = vsub.f32 1.0, %v1266_v34  ;;  %1491 = vmatpush.msra.mxu3 %v53_v42  ;;  %v1254_v53 = vadd.f32 %v1953_v24, %v1253_v37  ;;  %v81_v34 = vld [vmem:[%s2675_s5 + $0x10] sm:$0xff] }
 0x755   :  { %v1247_v48 = vor.u32 1.1754944e-38, %v1246_v38  ;;  %vm1245_vm15 = vcmp.eq.f32.partialorder %v1244_v36, 8.507059e+37 }
 0x756   :  { %v1268_v58 = vmul.f32 %v2486_v27, %v1267_v43  ;;  %v1258_v2 = vsel %vm1257_vm4, %v1953_v24, %v1254_v53 }
 0x757   :  { %v2488_v40 = vpop.xlane.xlu1 %1203  ;;  %v1263_v10 = vsel %vm1260_vm6, %v1262_v3, %v1258_v2 }
 0x758   :  { %v1269_v4 = vadd.f32 %v2486_v27, %v1268_v58  ;;  %v1264_v47 = vmul.f32 %v2439_v32, %v1263_v10  ;;  %v1321_v37 = vand.u32 2147483648, %v2488_v40  ;;  %vm1315_vm5 = vweird.f32 %v2488_v40 }
 0x759   :  { %v1957_v29 = vpop.eup %1956 }
 0x75a   :  { %v1236_v31 = vmul.f32 %v1957_v29, %v1189_v54  ;;  %v2490_v51 = vpop.xlane.xlu0 %1197  ;;  %v2492_v33 = vpop.eup %1958  ;;  %vm1241_vm11 = vweird.f32 %v1957_v29  ;;  %v1273_v14 = vsel %vm1272_vm8, %v2486_v27, %v1269_v4  ;;  %v1887_v4 = vld [vmem:[%s2674_s4 + $0x147] ss:$0 sm:$0xff] }
 0x75b   :  { %1960 = vrcp.f32 %v2490_v51  ;;  %v1296_v39 = vmul.f32 %v2492_v33, %v2481_v9  ;;  %vm1242_vm13 = vmor %vm1240_vm12, %vm1241_vm11  ;;  %vm1301_vm9 = vweird.f32 %v2492_v33  ;;  %v1307_v9 = vor.u32 1.1754944e-38, %v1306_v15 }
 0x75c   :  { %v1237_v25 = vsub.f32 1.0, %v1236_v31  ;;  %1962 = vrcp.f32 %v2488_v40  ;;  %vm2531_vm12 = vmor %vm1300_vm10, %vm1301_vm9  ;;  %v1291_v54 = vand.u32 2147483648, %v2490_v51 }
 0x75d   :  { %v1297_v49 = vsub.f32 1.0, %v1296_v39 }
 0x75e   :  { %v1238_v41 = vmul.f32 %v1957_v29, %v1237_v25 }
 0x75f   :  { %v1298_v0 = vmul.f32 %v2492_v33, %v1297_v49  ;;  %v55_v49 = vld [vmem:[%s2674_s4 + $0xf8] sm:$0xff] }
 0x760   :  { %v1239_v50 = vadd.f32 %v1957_v29, %v1238_v41  ;;  %v1319_v41 = vand.u32 2147483647, %v2488_v40 }
 0x761   :  { %v2503_v45 = vpop.eup %1960  ;;  %v1299_v11 = vadd.f32 %v2492_v33, %v1298_v0 }
 0x762   :  { %v1243_v52 = vsel %vm1242_vm13, %v1957_v29, %v1239_v50  ;;  %v2505_v55 = vpop.eup %1962  ;;  %v1281_v62 = vmul.f32 %v2503_v45, %v2490_v51  ;;  %vm1286_vm13 = vweird.f32 %v2503_v45  ;;  %v1322_v50 = vor.u32 1.1754944e-38, %v1321_v37  ;;  %v79_v37 = vld [vmem:[%s2675_s5] sm:$0xff] }
 0x763   :  { %v1248_v61 = vsel %vm1245_vm15, %v1247_v48, %v1243_v52  ;;  %v1311_v1 = vmul.f32 %v2505_v55, %v2488_v40  ;;  %v1303_v8 = vsel %vm2531_vm12, %v2492_v33, %v1299_v11  ;;  %vm1285_vm15 = vweird.f32 %v2490_v51  ;;  %v54_v40 = vld [vmem:[%s2674_s4 + $0xf0] sm:$0xff] }
 0x764   :  { %v1249_v63 = vmul.f32 %v2449_v59, %v1248_v61  ;;  %v1282_v5 = vsub.f32 1.0, %v1281_v62  ;;  %v1274_v59 = vand.u32 2147483647, %v2475_v20  ;;  %v1308_v29 = vsel %vm1305_vm14, %v1307_v9, %v1303_v8  ;;  %vm2547_vm3 = vmor %vm1285_vm15, %vm1286_vm13 }
 0x765   :  { %v1312_v12 = vsub.f32 1.0, %v1311_v1  ;;  %v1289_v33 = vand.u32 2147483647, %v2490_v51  ;;  %vm1316_vm4 = vweird.f32 %v2505_v55  ;;  %v1292_v51 = vor.u32 1.1754944e-38, %v1291_v54 }
 0x766   :  { %1823 = vmatmul.msk.f32.vlgmr.msrb.gmra.mxu3 %vm360_vm2, %v1249_v63  ;;  %v1283_v16 = vmul.f32 %v2503_v45, %v1282_v5  ;;  %vm1275_vm11 = vcmp.eq.f32.partialorder %v1274_v59, 8.507059e+37  ;;  %v1309_v39 = vmul.f32 %v2447_v44, %v1308_v29  ;;  %vm1317_vm7 = vmor %vm1315_vm5, %vm1316_vm4  ;;  %vm1320_vm8 = vcmp.eq.f32.partialorder %v1319_v41, 8.507059e+37  ;;  %v62_v41 = vld [vmem:[%s2674_s4 + $0x130] sm:$0xff] }
 0x767   :  { %v1278_v21 = vsel %vm1275_vm11, %v1277_v17, %v1273_v14  ;;  %v1313_v22 = vmul.f32 %v2505_v55, %v1312_v12  ;;  %vm1290_vm6 = vcmp.eq.f32.partialorder %v1289_v33, 8.507059e+37  ;;  %vm1659_vm13 = vcmask 523264  }
 0x768   :  { %v1284_v32 = vadd.f32 %v2503_v45, %v1283_v16  ;;  %v1279_v31 = vmul.f32 %v2443_v46, %v1278_v21 }
 0x769   :  { %v1314_v25 = vadd.f32 %v2505_v55, %v1313_v22 }
 0x76a   :  { %v1288_v46 = vsel %vm2547_vm3, %v2503_v45, %v1284_v32 }
 0x76b   :  { %v1293_v42 = vsel %vm1290_vm6, %v1292_v51, %v1288_v46  ;;  %v1318_v43 = vsel %vm1317_vm7, %v2505_v55, %v1314_v25  ;;  %v80_v25 = vld [vmem:[%s2675_s5 + $0x8] sm:$0xff] }
 0x76c   :  { %v1294_v45 = vmul.f32 %v2455_v57, %v1293_v42  ;;  %v1323_v48 = vsel %vm1320_vm8, %v1322_v50, %v1318_v43  ;;  %v60_v50 = vld [vmem:[%s2674_s4 + $0x120] sm:$0xff] }
 0x76d   :  { %v1870_v20 = vpop.permute.xlu0 %1869  ;;  %v1324_v44 = vmul.f32 %v2457_v60, %v1323_v48 }
 0x76e   :  { %v1871_v23 = vunpack.i.l.bf16 %v1870_v20  ;;  %v1348_v24 = vpop.f32.mrf.mxu2  ;;  %1824 = vmatmul.msk.f32.gmra.mxu3 %vm360_vm2, %v1264_v47  ;;  %v1872_v26 = vunpack.i.h.bf16 %v1870_v20 }
 0x76f   :  { %1829 = vmatmul.msk.f32.vlgmr.msra.gmra.mxu2 %vm219_vm1, %v1348_v24  ;;  %v1875_v27 = vpop.permute.xlu1 %1874 }
 0x770   :  { %1403 = vmatpush.msra.mxu0 %v1871_v23  ;;  %v1876_v30 = vunpack.i.l.bf16 %v1875_v27  ;;  %v1877_v38 = vunpack.i.h.bf16 %v1875_v27 }
 0x772   :  { %1404 = vmatpush.msra.mxu0 %v1872_v26  ;;  %1432 = vmatpush.msra.mxu1 %v1876_v30 }
 0x773   :  { %1825 = vmatmul.msk.f32.vlgmr.msra.gmra.mxu0 %vm360_vm2, %v1279_v31 }
 0x774   :  { %1433 = vmatpush.msra.mxu1 %v1877_v38  ;;  %1520 = vmatpush.msrb.mxu0 %v54_v40 }
 0x775   :  { %1827 = vmatmul.msk.f32.vlgmr.msra.gmra.mxu1 %vm360_vm2, %v1309_v39  ;;  %v63_v39 = vld [vmem:[%s2674_s4 + $0x138] sm:$0xff] }
 0x776   :  { %v1351_v36 = vpop.f32.mrf.mxu2  ;;  %1549 = vmatpush.msrb.mxu1 %v55_v49  ;;  %1674 = vmatpush.msrb.mxu3 %v63_v39 }
 0x777   :  { %1830 = vmatmul.msk.f32.gmra.mxu2 %vm219_vm1, %v1351_v36  ;;  %v61_v36 = vld [vmem:[%s2674_s4 + $0x128] sm:$0xff] }
 0x778   :  { %1675 = vmatpush.msrb.mxu3 %v62_v41 }
 0x77a   :  { %1676 = vmatpush.msrb.mxu3 %v61_v36 }
 0x77b   :  { %1826 = vmatmul.msk.f32.gmra.mxu0 %vm360_vm2, %v1294_v45 }
 0x77c   :  { %1677 = vmatpush.msrb.mxu3 %v60_v50 }
 0x77d   :  { %1828 = vmatmul.msk.f32.gmra.mxu1 %vm360_vm2, %v1324_v44  ;;  %v59_v44 = vld [vmem:[%s2674_s4 + $0x118] sm:$0xff] }
 0x77e   :  { %1678 = vmatpush.msrb.mxu3 %v59_v44 }
 0x7e9   :  { %v1377_v52 = vpop.f32.mrf.mxu3 }
 0x7ea   :  { %1831 = vmatmul.msk.f32.vlgmr.msra.gmra.mxu3 %vm219_vm1, %v1377_v52 }
 0x7f0   :  { %v1406_v57 = vpop.f32.mrf.mxu0 }
 0x7f1   :  { %v1380_v53 = vpop.f32.mrf.mxu3  ;;  %1833 = vmatmul.msk.f32.vlgmr.msrb.gmra.mxu0 %vm219_vm1, %v1406_v57 }
 0x7f2   :  { %1832 = vmatmul.msk.f32.gmra.mxu3 %vm219_vm1, %v1380_v53  ;;  %v1435_v60 = vpop.f32.mrf.mxu1  ;;  %v1464_v58 = vpop.f32.mrf.mxu2 }
 0x7f3   :  { %1835 = vmatmul.msk.f32.vlgmr.msrb.gmra.mxu1 %vm219_vm1, %v1435_v60  ;;  %v1557_v62 = vsel %vm93_vm0, %v1464_v58, 0.0 }
 0x7f8   :  { %v1409_v55 = vpop.f32.mrf.mxu0 }
 0x7f9   :  { %1834 = vmatmul.msk.f32.gmra.mxu0 %vm219_vm1, %v1409_v55 }
 0x7fa   :  { %v1438_v56 = vpop.f32.mrf.mxu1  ;;  %v1467_v7 = vpop.f32.mrf.mxu2 }
 0x7fb   :  { %1836 = vmatmul.msk.f32.gmra.mxu1 %vm219_vm1, %v1438_v56  ;;  %v1564_v12 = vsel %vm93_vm0, %v1467_v7, 0.0  ;;  %v1888_v56 = vld [vmem:[%s2674_s4 + $0x14b] ss:$0 sm:$0xff] }
 0x86d   :  { %v1493_v61 = vpop.f32.mrf.mxu3 }
 0x86e   :  { %v1558_v63 = vsel %vm93_vm0, %v1493_v61, 0.0  ;;  %v1522_v35 = vpop.f32.mrf.mxu0 }
 0x86f   :  { %v1559_v0 = vadd.f32 %v1558_v63, %v1557_v62  ;;  %v1560_v1 = vsel %vm93_vm0, %v1522_v35, 0.0  ;;  %v1889_v63 = vld [vmem:[%s2674_s4 + $0x14c] ss:$0 sm:$0xff] }
 0x870   :  { %v1551_v3 = vpop.f32.mrf.mxu1 }
 0x871   :  { %v1561_v2 = vadd.f32 %v1560_v1, %v1559_v0  ;;  %v1562_v5 = vsel %vm93_vm0, %v1551_v3, 0.0 }
 0x873   :  { %v1563_v59 = vadd.f32 %v1562_v5, %v1561_v2 }
 0x875   :  { %v1572_v10 = vadd.f32 %v1887_v4, %v1563_v59  ;;  %v1496_v11 = vpop.f32.mrf.mxu3 }
 0x876   :  { %v1565_v14 = vsel %vm93_vm0, %v1496_v11, 0.0  ;;  %v1525_v15 = vpop.f32.mrf.mxu0  ;;  %v57_v11 = vld [vmem:[%s2674_s4 + $0x108] sm:$0xff] }
 0x877   :  { %v1566_v16 = vadd.f32 %v1565_v14, %v1564_v12  ;;  %v1567_v17 = vsel %vm93_vm0, %v1525_v15, 0.0  ;;  %v1574_v18 = vadd.f32 %v1572_v10, %v2358_v6  ;;  %v58_v10 = vld [vmem:[%s2674_s4 + $0x110] sm:$0xff]  ;;  %v56_v12 = vld [vmem:[%s2674_s4 + $0x100] sm:$0xff] }
 0x878   :  { %v1554_v19 = vpop.f32.mrf.mxu1  ;;  %1679 = vmatpush.msrb.mxu3 %v58_v10  ;;  %v1890_v14 = vld [vmem:[%s2675_s5 + $0x20] ss:$0 sm:$0xff] }
 0x879   :  { %v1568_v47 = vadd.f32 %v1567_v17, %v1566_v16  ;;  %v1576_v20 = vsel %vm93_vm0, %v1574_v18, 0.0  ;;  %v1569_v21 = vsel %vm93_vm0, %v1554_v19, 0.0 }
 0x87a   :  { %1577 = vadd.xlane.f32.xlu2 %v1576_v20  ;;  %1680 = vmatpush.msrb.mxu3 %v57_v11  ;;  %v1891_v20 = vld [vmem:[%s2674_s4 + $0x148] ss:$0 sm:$0xff] }
 0x87b   :  { %v1570_v8 = vadd.f32 %v1569_v21, %v1568_v47 }
 0x87c   :  { %1681 = vmatpush.msrb.mxu3 %v56_v12 }
 0x87d   :  { %v1573_v22 = vadd.f32 %v1887_v4, %v1570_v8 }
 0x87f   :  { %v1575_v23 = vadd.f32 %v1573_v22, %v2362_v13  ;;  %v82_v13 = vld [vmem:[%s2675_s5 + $0x18] sm:$0xff] }
 0x880   :  { %1645 = vmatpush.msrb.mxu2 %v82_v13 }
 0x881   :  { %v1579_v24 = vsel %vm93_vm0, %v1575_v23, 0.0 }
 0x882   :  { %1580 = vadd.xlane.f32.xlu0 %v1579_v24  ;;  %1646 = vmatpush.msrb.mxu2 %v81_v34 }
 0x884   :  { %1647 = vmatpush.msrb.mxu2 %v80_v25 }
 0x886   :  { %1648 = vmatpush.msrb.mxu2 %v79_v37 }
 0x8ed   :  { %v1578_v9 = vpop.xlane.xlu2 %1577 }
 0x8ee   :  { %v1582_v32 = vmul.f32 %v1578_v9, %v2321_v28 }
 0x8f0   :  { %v1584_v54 = vsub.f32 %v1574_v18, %v1582_v32 }
 0x8f2   :  { %v1586_v26 = vmul.f32 %v1584_v54, %v1584_v54 }
 0x8f4   :  { %v1588_v6 = vsel %vm93_vm0, %v1586_v26, 0.0 }
 0x8f5   :  { %1589 = vadd.xlane.f32.xlu1 %v1588_v6  ;;  %v1581_v27 = vpop.xlane.xlu0 %1580 }
 0x8f6   :  { %v1583_v29 = vmul.f32 %v1581_v27, %v2321_v28 }
 0x8f8   :  { %v1585_v30 = vsub.f32 %v1575_v23, %v1583_v29 }
 0x8fa   :  { %v1587_v31 = vmul.f32 %v1585_v30, %v1585_v30 }
 0x8fc   :  { %v1591_v33 = vsel %vm93_vm0, %v1587_v31, 0.0 }
 0x8fd   :  { %1592 = vadd.xlane.f32.xlu2 %v1591_v33 }
 0x968   :  { %v1590_v38 = vpop.xlane.xlu1 %1589 }
 0x969   :  { %v1594_v46 = vmul.f32 %v1590_v38, %v2321_v28 }
 0x96b   :  { %v1596_v51 = vadd.f32 1e-05, %v1594_v46 }
 0x96d   :  { %1964 = vrsqrt.f32 %v1596_v51  ;;  %vm1604_vm2 = vweird.f32 %v1596_v51 }
 0x970   :  { %v1593_v42 = vpop.xlane.xlu2 %1592 }
 0x971   :  { %v1595_v43 = vmul.f32 %v1593_v42, %v2321_v28 }
 0x973   :  { %v1965_v45 = vpop.eup %1964  ;;  %v1597_v48 = vadd.f32 1e-05, %v1595_v43 }
 0x974   :  { %v1599_v40 = vmul.f32 %v1965_v45, %v1596_v51  ;;  %vm1605_vm1 = vweird.f32 %v1965_v45 }
 0x975   :  { %1966 = vrsqrt.f32 %v1597_v48  ;;  %vm1606_vm9 = vmor %vm1604_vm2, %vm1605_vm1  ;;  %vm1614_vm11 = vweird.f32 %v1597_v48 }
 0x976   :  { %v1600_v49 = vmul.f32 %v1965_v45, %v1599_v40 }
 0x978   :  { %v1601_v52 = vmul.f32 0.5, %v1600_v49  ;;  %v1892_v49 = vld [vmem:[%s2674_s4 + $0x14d] ss:$0 sm:$0xff] }
 0x97a   :  { %v1602_v57 = vsub.f32 1.5, %v1601_v52 }
 0x97b   :  { %v1967_v53 = vpop.eup %1966 }
 0x97c   :  { %v1603_v60 = vmul.f32 %v1965_v45, %v1602_v57  ;;  %v1609_v55 = vmul.f32 %v1967_v53, %v1597_v48  ;;  %vm1615_vm10 = vweird.f32 %v1967_v53 }
 0x97d   :  { %vm1616_vm12 = vmor %vm1614_vm11, %vm1615_vm10 }
 0x97e   :  { %v1607_v58 = vsel %vm1606_vm9, %v1965_v45, %v1603_v60  ;;  %v1610_v61 = vmul.f32 %v1967_v53, %v1609_v55 }
 0x97f   :  { %v1618_v62 = vmul.f32 %v1607_v58, %v1584_v54 }
 0x980   :  { %v1611_v35 = vmul.f32 0.5, %v1610_v61 }
 0x981   :  { %v1621_v0 = vmul.f32 %v1888_v56, %v1618_v62 }
 0x982   :  { %v1612_v1 = vsub.f32 1.5, %v1611_v35 }
 0x983   :  { %v1624_v2 = vadd.f32 %v1889_v63, %v1621_v0 }
 0x984   :  { %v1613_v3 = vmul.f32 %v1967_v53, %v1612_v1 }
 0x985   :  { %1837 = vmatmul.msk.f32.vlgmr.msrb.gmra.mxu2 %vm93_vm0, %v1624_v2 }
 0x986   :  { %v1617_v4 = vsel %vm1616_vm12, %v1967_v53, %v1613_v3  ;;  %v1893_v53 = vld [vmem:[%s2674_s4 + $0x14e] ss:$0 sm:$0xff]  ;;  %s2003_s4 = smov 128  }
 0x987   :  { %v1619_v5 = vmul.f32 %v1617_v4, %v1585_v30 }
 0x989   :  { %v1622_v7 = vmul.f32 %v1888_v56, %v1619_v5 }
 0x98b   :  { %v1625_v59 = vadd.f32 %v1889_v63, %v1622_v7 }
 0x98d   :  { %1838 = vmatmul.msk.f32.gmra.mxu2 %vm93_vm0, %v1625_v59 }
 0xa08   :  { %v1650_v15 = vpop.f32.mrf.mxu2 }
 0xa09   :  { %v1651_v16 = vadd.f32 %v1890_v14, %v1650_v15 }
 0xa0b   :  { %v1656_v17 = vmax.f32 %v1651_v16, 0.0 }
 0xa0d   :  { %1839 = vmatmul.msk.f32.vlgmr.msrb.gmra.mxu3 %vm1659_vm13, %v1656_v17 }
 0xa10   :  { %v1653_v18 = vpop.f32.mrf.mxu2 }
 0xa11   :  { %v1654_v47 = vadd.f32 %v1890_v14, %v1653_v18 }
 0xa13   :  { %v1657_v19 = vmax.f32 %v1654_v47, 0.0 }
 0xa15   :  { %1840 = vmatmul.msk.f32.gmra.mxu3 %vm1659_vm13, %v1657_v19 }
 0xa90   :  { %v1683_v21 = vpop.f32.mrf.mxu3 }
 0xa91   :  { %v1684_v8 = vadd.f32 %v1891_v20, %v1683_v21 }
 0xa93   :  { %v1689_v22 = vadd.f32 %v1684_v8, %v1624_v2 }
 0xa95   :  { %v1691_v23 = vsel %vm93_vm0, %v1689_v22, 0.0 }
 0xa96   :  { %1692 = vadd.xlane.f32.xlu0 %v1691_v23 }
 0xa98   :  { %v1686_v24 = vpop.f32.mrf.mxu3 }
 0xa99   :  { %v1687_v9 = vadd.f32 %v1891_v20, %v1686_v24 }
 0xa9b   :  { %v1690_v32 = vadd.f32 %v1687_v9, %v1625_v59 }
 0xa9d   :  { %v1694_v54 = vsel %vm93_vm0, %v1690_v32, 0.0 }
 0xa9e   :  { %1695 = vadd.xlane.f32.xlu2 %v1694_v54 }
 0xb09   :  { %v1693_v26 = vpop.xlane.xlu0 %1692 }
 0xb0a   :  { %v1697_v6 = vmul.f32 %v1693_v26, %v2321_v28 }
 0xb0c   :  { %v1699_v27 = vsub.f32 %v1689_v22, %v1697_v6 }
 0xb0e   :  { %v1701_v29 = vmul.f32 %v1699_v27, %v1699_v27 }
 0xb10   :  { %v1703_v30 = vsel %vm93_vm0, %v1701_v29, 0.0 }
 0xb11   :  { %v1696_v31 = vpop.xlane.xlu2 %1695  ;;  %1704 = vadd.xlane.f32.xlu1 %v1703_v30 }
 0xb12   :  { %v1698_v33 = vmul.f32 %v1696_v31, %v2321_v28 }
 0xb14   :  { %v1700_v13 = vsub.f32 %v1690_v32, %v1698_v33 }
 0xb16   :  { %v1702_v34 = vmul.f32 %v1700_v13, %v1700_v13 }
 0xb18   :  { %v1706_v25 = vsel %vm93_vm0, %v1702_v34, 0.0 }
 0xb19   :  { %1707 = vadd.xlane.f32.xlu0 %v1706_v25 }
 0xb84   :  { %v1705_v37 = vpop.xlane.xlu1 %1704 }
 0xb85   :  { %v1709_v38 = vmul.f32 %v1705_v37, %v2321_v28 }
 0xb87   :  { %v1711_v46 = vadd.f32 1e-05, %v1709_v38 }
 0xb89   :  { %1968 = vrsqrt.f32 %v1711_v46  ;;  %vm1719_vm15 = vweird.f32 %v1711_v46 }
 0xb8c   :  { %v1708_v51 = vpop.xlane.xlu0 %1707 }
 0xb8d   :  { %v1710_v39 = vmul.f32 %v1708_v51, %v2321_v28 }
 0xb8f   :  { %v1969_v41 = vpop.eup %1968  ;;  %v1712_v36 = vadd.f32 1e-05, %v1710_v39 }
 0xb90   :  { %v1714_v42 = vmul.f32 %v1969_v41, %v1711_v46  ;;  %vm1720_vm14 = vweird.f32 %v1969_v41 }
 0xb91   :  { %1970 = vrsqrt.f32 %v1712_v36  ;;  %vm1721_vm3 = vmor %vm1719_vm15, %vm1720_vm14  ;;  %vm1729_vm5 = vweird.f32 %v1712_v36 }
 0xb92   :  { %v1715_v43 = vmul.f32 %v1969_v41, %v1714_v42 }
 0xb94   :  { %v1716_v50 = vmul.f32 0.5, %v1715_v43 }
 0xb96   :  { %v1717_v45 = vsub.f32 1.5, %v1716_v50 }
 0xb97   :  { %v1971_v48 = vpop.eup %1970 }
 0xb98   :  { %v1718_v44 = vmul.f32 %v1969_v41, %v1717_v45  ;;  %v1724_v40 = vmul.f32 %v1971_v48, %v1712_v36  ;;  %vm1730_vm4 = vweird.f32 %v1971_v48 }
 0xb99   :  { %vm1731_vm6 = vmor %vm1729_vm5, %vm1730_vm4 }
 0xb9a   :  { %v1722_v52 = vsel %vm1721_vm3, %v1969_v41, %v1718_v44  ;;  %v1725_v57 = vmul.f32 %v1971_v48, %v1724_v40 }
 0xb9b   :  { %v1733_v28 = vmul.f32 %v1722_v52, %v1699_v27 }
 0xb9c   :  { %v1726_v60 = vmul.f32 0.5, %v1725_v57 }
 0xb9d   :  { %v1736_v55 = vmul.f32 %v1892_v49, %v1733_v28 }
 0xb9e   :  { %v1727_v56 = vsub.f32 1.5, %v1726_v60 }
 0xb9f   :  { %v1739_v58 = vadd.f32 %v1893_v53, %v1736_v55 }
 0xba0   :  { %v1728_v61 = vmul.f32 %v1971_v48, %v1727_v56 }
 0xba1   :  { %1741 = vst.msk [vmem:[#allocation2] sm:$0xff] %vm93_vm0, %v1739_v58 }
 0xba2   :  { %v1732_v62 = vsel %vm1731_vm6, %v1971_v48, %v1728_v61 }
 0xba3   :  { %v1734_v63 = vmul.f32 %v1732_v62, %v1700_v13 }
 0xba5   :  { %v1737_v35 = vmul.f32 %v1892_v49, %v1734_v63 }
 0xba7   :  { %v1740_v0 = vadd.f32 %v1893_v53, %v1737_v35 }
 0xba9   :  { %1742 = vst.msk [vmem:[#allocation2 + $0x8] sm:$0xff] %vm93_vm0, %v1740_v0 }
 0xbaa   :  { %1755 = dma.vmem_to_hbm [thread:$0]  %s1748_s8, 256, %s1750_s11, [#allocation3], %s2003_s4, %s2003_s4, %s2004_s12  }
 0xbab   :  { %1996 = dma.done.wait [#allocation3], 256  }
 0xbac   :  { %1997 = vsyncadd [#allocation3], 4294967040 }
 0xbad   :  { %1760 = vsyncpa [#allocation3], 1 }

</bundles_post_ra>
